<compile_context>
chip_gen: v6e
topology: v6e:2x2x1
jax: 0.10.0
libtpu: 0.0.40
codegen_flags: <defaults>
</compile_context>

<pallas_src>
import jax
import jax.numpy as jnp
from jax.experimental import pallas as pl
from jax.experimental.pallas import tpu as pltpu

EPS = 1e-5        # PyTorch nn.LayerNorm default eps
NEG_INF = -1e10   # Categorical available_actions masking value (matches MAPPO code)
AUXW = 128        # lane-dense auxiliary output width (action + logp packed)


def _round_up(x, m):
    return (x + m - 1) // m * m


def _layernorm(x, g, b):
    mu = jnp.mean(x, axis=-1, keepdims=True)
    var = jnp.mean(jnp.square(x - mu), axis=-1, keepdims=True)
    return (x - mu) * jax.lax.rsqrt(var + EPS) * g + b


def r_actor_kernel(obs_ref, h0_ref, mask_ref, avail_ref,
                   ln0g_ref, ln0b_ref,
                   w1_ref, b1_ref, ln1g_ref, ln1b_ref,
                   w2_ref, b2_ref, ln2g_ref, ln2b_ref,
                   wgru_ref, bgru_ref,
                   ln3g_ref, ln3b_ref,
                   wact_ref, bact_ref,
                   aux_ref, hout_ref):
    H = h0_ref.shape[-1]
    AP = wact_ref.shape[-1]   # action dim padded to a multiple of 128

    # ---- MLPBase.feature_norm ----
    x = _layernorm(obs_ref[...], ln0g_ref[...], ln0b_ref[...])

    # ---- MLPLayer.fc1: Linear + ReLU + LayerNorm (bf16 matmul, f32 accumulate) ----
    x = jnp.dot(x.astype(jnp.bfloat16), w1_ref[...],
                preferred_element_type=jnp.float32) + b1_ref[...]
    x = jnp.maximum(x, 0.0)
    x = _layernorm(x, ln1g_ref[...], ln1b_ref[...])

    # ---- MLPLayer.fc2[0]: Linear + ReLU + LayerNorm (layer_N = 1) ----
    x = jnp.dot(x.astype(jnp.bfloat16), w2_ref[...],
                preferred_element_type=jnp.float32) + b2_ref[...]
    x = jnp.maximum(x, 0.0)
    x = _layernorm(x, ln2g_ref[...], ln2b_ref[...])

    # ---- RNNLayer: single-step GRU (recurrent_N = 1), fused into one matmul ----
    # wgru columns: [0:2H]  = (W_ir|W_iz stacked with W_hr|W_hz)  -> gi_rz + gh_rz
    #               [2H:3H] = W_in (h-rows zero)                   -> gi_n
    #               [3H:4H] = W_hn (x-rows zero)                   -> gh_n
    h = h0_ref[...] * mask_ref[...]                     # masks reset hidden state
    cat = jnp.concatenate([x.astype(jnp.bfloat16), h.astype(jnp.bfloat16)], axis=-1)
    g = jnp.dot(cat, wgru_ref[...], preferred_element_type=jnp.float32) + bgru_ref[...]
    r = jax.nn.sigmoid(g[:, 0:H])
    z = jax.nn.sigmoid(g[:, H:2 * H])
    n = jnp.tanh(g[:, 2 * H:3 * H] + r * g[:, 3 * H:4 * H])
    h_new = (1.0 - z) * n + z * h
    hout_ref[...] = h_new                               # returned rnn_states (un-normalized)

    # ---- RNNLayer output LayerNorm ----
    feat = _layernorm(h_new, ln3g_ref[...], ln3b_ref[...])

    # ---- ACTLayer (Discrete), deterministic mode ----
    logits = jnp.dot(feat.astype(jnp.bfloat16), wact_ref[...],
                     preferred_element_type=jnp.float32) + bact_ref[...]
    logits = jnp.where(avail_ref[...] > 0.0, logits, NEG_INF)   # unavailable + pad columns

    m = jnp.max(logits, axis=-1, keepdims=True)
    ids = jax.lax.broadcasted_iota(jnp.int32, logits.shape, 1)
    # argmax with first-max tie-breaking (matches torch.argmax)
    action = jnp.min(jnp.where(logits >= m, ids, AP), axis=-1, keepdims=True)
    # log-prob of the mode: its logit is exactly m, so logp = m - logsumexp(logits)
    lse = m + jnp.log(jnp.sum(jnp.exp(logits - m), axis=-1, keepdims=True))
    logp = m - lse

    # ---- lane-dense packed auxiliary output: lane0 = action, lane1 = logp ----
    lane = jax.lax.broadcasted_iota(jnp.int32, aux_ref.shape, 1)
    aux_ref[...] = jnp.where(lane == 0, action.astype(jnp.float32),
                             jnp.where(lane == 1, logp, 0.0))


def r_actor_forward(obs, rnn_states, rnn_cells, masks, params,
                    available_actions=None, deterministic=True, tile_n=256):
    """obs: (N, D) f32; rnn_states/rnn_cells: (N, recurrent_N=1, H) f32; masks: (N, 1) f32."""
    # TODO(synk): only the deterministic (mode) action path is implemented; stochastic
    # Categorical sampling would need pltpu.prng_* (Gumbel-max) and is left out.
    del deterministic
    N, D = obs.shape
    H = params["w1"].shape[1]
    A = params["w_act"].shape[1]
    AP = _round_up(A, 128)          # lane-dense action head

    obs = obs.astype(jnp.float32)
    h0 = rnn_states[:, 0, :].astype(jnp.float32)
    masks = masks.astype(jnp.float32)
    if available_actions is None:
        avail = jnp.ones((N, A), jnp.float32)
    else:
        avail = available_actions.astype(jnp.float32)
    avail = jnp.pad(avail, ((0, 0), (0, AP - A)))        # padded actions -> masked out

    # ---- build fused GRU weight / bias (f32 math, cast to bf16 below) ----
    w_ih, w_hh = params["w_ih"], params["w_hh"]          # (H, 3H) each, gate order r,z,n
    b_ih, b_hh = params["b_ih"], params["b_hh"]          # (1, 3H) each
    wgru = jnp.zeros((2 * H, 4 * H), jnp.float32)
    wgru = wgru.at[:H, :2 * H].set(w_ih[:, :2 * H])
    wgru = wgru.at[H:, :2 * H].set(w_hh[:, :2 * H])
    wgru = wgru.at[:H, 2 * H:3 * H].set(w_ih[:, 2 * H:])
    wgru = wgru.at[H:, 3 * H:].set(w_hh[:, 2 * H:])
    bgru = jnp.concatenate([b_ih[:, :2 * H] + b_hh[:, :2 * H],
                            b_ih[:, 2 * H:], b_hh[:, 2 * H:]], axis=-1)

    w_act = jnp.pad(params["w_act"], ((0, 0), (0, AP - A)))
    b_act = jnp.pad(params["b_act"], ((0, 0), (0, AP - A)))

    # ---- batch tiling / padding ----
    tn = tile_n if N >= tile_n else _round_up(N, 8)
    Np = _round_up(N, tn)
    pad = Np - N
    if pad:
        obs = jnp.pad(obs, ((0, pad), (0, 0)))
        h0 = jnp.pad(h0, ((0, pad), (0, 0)))
        masks = jnp.pad(masks, ((0, pad), (0, 0)))
        avail = jnp.pad(avail, ((0, pad), (0, 0)), constant_values=1.0)

    bf16 = jnp.bfloat16
    w1 = params["w1"].astype(bf16)
    w2 = params["w2"].astype(bf16)
    wgru = wgru.astype(bf16)
    w_act = w_act.astype(bf16)

    tile = lambda i: (i, 0)   # batch-tiled operands
    rep = lambda i: (0, 0)    # VMEM-resident weights / biases

    in_specs = [
        pl.BlockSpec((tn, D), tile),
        pl.BlockSpec((tn, H), tile),
        pl.BlockSpec((tn, 1), tile),
        pl.BlockSpec((tn, AP), tile),
        pl.BlockSpec((1, D), rep), pl.BlockSpec((1, D), rep),
        pl.BlockSpec((D, H), rep), pl.BlockSpec((1, H), rep),
        pl.BlockSpec((1, H), rep), pl.BlockSpec((1, H), rep),
        pl.BlockSpec((H, H), rep), pl.BlockSpec((1, H), rep),
        pl.BlockSpec((1, H), rep), pl.BlockSpec((1, H), rep),
        pl.BlockSpec((2 * H, 4 * H), rep), pl.BlockSpec((1, 4 * H), rep),
        pl.BlockSpec((1, H), rep), pl.BlockSpec((1, H), rep),
        pl.BlockSpec((H, AP), rep), pl.BlockSpec((1, AP), rep),
    ]
    out_specs = [
        pl.BlockSpec((tn, AUXW), tile),
        pl.BlockSpec((tn, H), tile),
    ]

    flops = 2 * Np * (D * H + H * H + 2 * H * 4 * H + H * AP)
    transcendentals = Np * (3 * H + AP + 8)
    weight_bytes = 2 * (D * H + H * H + 2 * H * 4 * H + H * AP) \
        + 4 * (2 * D + 8 * H + 4 * H + 2 * AP)
    bytes_accessed = 4 * Np * (D + H + 1 + AP) + 4 * Np * (H + AUXW) + weight_bytes

    aux_p, h_new_p = pl.pallas_call(
        r_actor_kernel,
        out_shape=(jax.ShapeDtypeStruct((Np, AUXW), jnp.float32),
                   jax.ShapeDtypeStruct((Np, H), jnp.float32)),
        grid_spec=pltpu.PrefetchScalarGridSpec(
            num_scalar_prefetch=0,
            grid=(Np // tn,),
            in_specs=in_specs,
            out_specs=out_specs),
        compiler_params=pltpu.CompilerParams(
            dimension_semantics=("parallel",)),
        cost_estimate=pl.CostEstimate(flops=int(flops),
                                      transcendentals=int(transcendentals),
                                      bytes_accessed=int(bytes_accessed)),
    )(obs, h0, masks, avail,
      params["ln0_g"], params["ln0_b"],
      w1, params["b1"], params["ln1_g"], params["ln1_b"],
      w2, params["b2"], params["ln2_g"], params["ln2_b"],
      wgru, bgru,
      params["ln3_g"], params["ln3_b"],
      w_act, b_act)

    actions = aux_p[:N, 0:1].astype(jnp.int32)    # (N, 1) int32 (Categorical.mode())
    action_log_probs = aux_p[:N, 1:2]             # (N, 1) f32
    rnn_states_out = h_new_p[:N][None, :, :]      # (N,1,H).permute(1,0,2) -> (1, N, H)
    # GRU path: rnn_cells are just permuted and returned unchanged.
    rnn_cells_out = None if rnn_cells is None else jnp.transpose(rnn_cells, (1, 0, 2))
    return actions, action_log_probs, rnn_states_out, rnn_cells_out


def _reference_forward(obs, h0, masks, avail, params):
    """Pure-JAX f32 reference of the same forward pass (for a loose sanity check)."""
    def ln(x, g, b):
        mu = x.mean(-1, keepdims=True)
        var = ((x - mu) ** 2).mean(-1, keepdims=True)
        return (x - mu) * jax.lax.rsqrt(var + EPS) * g + b

    x = ln(obs, params["ln0_g"], params["ln0_b"])
    x = jnp.maximum(x @ params["w1"] + params["b1"], 0.0)
    x = ln(x, params["ln1_g"], params["ln1_b"])
    x = jnp.maximum(x @ params["w2"] + params["b2"], 0.0)
    x = ln(x, params["ln2_g"], params["ln2_b"])
    h = h0 * masks
    H = h.shape[-1]
    gi = x @ params["w_ih"] + params["b_ih"]
    gh = h @ params["w_hh"] + params["b_hh"]
    r = jax.nn.sigmoid(gi[:, :H] + gh[:, :H])
    z = jax.nn.sigmoid(gi[:, H:2 * H] + gh[:, H:2 * H])
    n = jnp.tanh(gi[:, 2 * H:] + r * gh[:, 2 * H:])
    h_new = (1.0 - z) * n + z * h
    feat = ln(h_new, params["ln3_g"], params["ln3_b"])
    logits = feat @ params["w_act"] + params["b_act"]
    logits = jnp.where(avail > 0.0, logits, NEG_INF)
    logp_all = jax.nn.log_softmax(logits, axis=-1)
    return h_new, logits, logp_all


if __name__ == "__main__":
    key = jax.random.PRNGKey(0)
    N, D, H, A = 8, 64, 128, 6   # batch, obs_dim, hidden_size, action_dim

    ks = jax.random.split(key, 12)

    def w(k, shape, scale=0.1):
        return (scale * jax.random.normal(k, shape)).astype(jnp.float32)

    params = dict(
        ln0_g=jnp.ones((1, D), jnp.float32), ln0_b=jnp.zeros((1, D), jnp.float32),
        w1=w(ks[0], (D, H)), b1=jnp.zeros((1, H), jnp.float32),
        ln1_g=jnp.ones((1, H), jnp.float32), ln1_b=jnp.zeros((1, H), jnp.float32),
        w2=w(ks[1], (H, H)), b2=jnp.zeros((1, H), jnp.float32),
        ln2_g=jnp.ones((1, H), jnp.float32), ln2_b=jnp.zeros((1, H), jnp.float32),
        w_ih=w(ks[2], (H, 3 * H)), b_ih=jnp.zeros((1, 3 * H), jnp.float32),
        w_hh=w(ks[3], (H, 3 * H)), b_hh=jnp.zeros((1, 3 * H), jnp.float32),
        ln3_g=jnp.ones((1, H), jnp.float32), ln3_b=jnp.zeros((1, H), jnp.float32),
        w_act=w(ks[4], (H, A)), b_act=jnp.zeros((1, A), jnp.float32),
    )

    obs = jax.random.normal(ks[5], (N, D), dtype=jnp.float32)
    rnn_states = jax.random.normal(ks[6], (N, 1, H), dtype=jnp.float32)
    rnn_cells = jax.random.normal(ks[7], (N, 1, H), dtype=jnp.float32)
    masks = jnp.ones((N, 1), jnp.float32).at[0, 0].set(0.0)  # one env resets

    actions, action_log_probs, rnn_states_out, rnn_cells_out = r_actor_forward(
        obs, rnn_states, rnn_cells, masks, params,
        available_actions=None, deterministic=True)
    jax.block_until_ready((actions, action_log_probs, rnn_states_out, rnn_cells_out))

    # ---- shape / range sanity ----
    assert actions.shape == (N, 1) and actions.dtype == jnp.int32
    assert action_log_probs.shape == (N, 1)
    assert rnn_states_out.shape == (1, N, H)
    assert rnn_cells_out.shape == (1, N, H)
    assert bool(jnp.all(actions >= 0)) and bool(jnp.all(actions < A))
    assert bool(jnp.all(jnp.isfinite(action_log_probs)))

    # ---- loose numerical check against a pure-JAX f32 reference (bf16 matmul tol) ----
    avail_ref = jnp.ones((N, A), jnp.float32)
    h_ref, logits_ref, logp_all_ref = _reference_forward(
        obs, rnn_states[:, 0, :], masks, avail_ref, params)
    assert bool(jnp.max(jnp.abs(rnn_states_out[0] - h_ref)) < 7e-2)
    sel = actions[:, 0]
    rows = jnp.arange(N)
    # kernel-chosen action must (near-)achieve the reference maximum logit
    assert bool(jnp.all(logits_ref[rows, sel] >= jnp.max(logits_ref, axis=-1) - 0.1))
    assert bool(jnp.max(jnp.abs(action_log_probs[:, 0] - logp_all_ref[rows, sel])) < 7e-2)

    print("KERNEL_OK")
</pallas_src>

<mosaic_0001>
module attributes {stable_mosaic.version = 11 : i64} {
  func.func @r_actor_kernel(%arg0: i32, %arg1: memref<8x64xf32, #tpu.memory_space<vmem>>, %arg2: memref<8x128xf32, #tpu.memory_space<vmem>>, %arg3: memref<8x1xf32, #tpu.memory_space<vmem>>, %arg4: memref<8x128xf32, #tpu.memory_space<vmem>>, %arg5: memref<1x64xf32, #tpu.memory_space<vmem>>, %arg6: memref<1x64xf32, #tpu.memory_space<vmem>>, %arg7: memref<64x128xbf16, #tpu.memory_space<vmem>>, %arg8: memref<1x128xf32, #tpu.memory_space<vmem>>, %arg9: memref<1x128xf32, #tpu.memory_space<vmem>>, %arg10: memref<1x128xf32, #tpu.memory_space<vmem>>, %arg11: memref<128x128xbf16, #tpu.memory_space<vmem>>, %arg12: memref<1x128xf32, #tpu.memory_space<vmem>>, %arg13: memref<1x128xf32, #tpu.memory_space<vmem>>, %arg14: memref<1x128xf32, #tpu.memory_space<vmem>>, %arg15: memref<256x512xbf16, #tpu.memory_space<vmem>>, %arg16: memref<1x512xf32, #tpu.memory_space<vmem>>, %arg17: memref<1x128xf32, #tpu.memory_space<vmem>>, %arg18: memref<1x128xf32, #tpu.memory_space<vmem>>, %arg19: memref<128x128xbf16, #tpu.memory_space<vmem>>, %arg20: memref<1x128xf32, #tpu.memory_space<vmem>>, %arg21: memref<8x128xf32, #tpu.memory_space<vmem>>, %arg22: memref<8x128xf32, #tpu.memory_space<vmem>>) attributes {dimension_semantics = [#tpu.dimension_semantics<parallel>], iteration_bounds = array<i64: 1>, scalar_prefetch = 0 : i64, scratch_operands = 0 : i64, tpu.core_type = #tpu.core_type<tc>, window_params = [{transform_indices = @transform_0, window_bounds = array<i64: 8, 64>}, {transform_indices = @transform_1, window_bounds = array<i64: 8, 128>}, {transform_indices = @transform_2, window_bounds = array<i64: 8, 1>}, {transform_indices = @transform_3, window_bounds = array<i64: 8, 128>}, {pipeline_mode = #tpu.pipeline_mode<synchronous>, transform_indices = @transform_4, window_bounds = array<i64: 1, 64>}, {pipeline_mode = #tpu.pipeline_mode<synchronous>, transform_indices = @transform_5, window_bounds = array<i64: 1, 64>}, {pipeline_mode = #tpu.pipeline_mode<synchronous>, transform_indices = @transform_6, window_bounds = array<i64: 64, 128>}, {pipeline_mode = #tpu.pipeline_mode<synchronous>, transform_indices = @transform_7, window_bounds = array<i64: 1, 128>}, {pipeline_mode = #tpu.pipeline_mode<synchronous>, transform_indices = @transform_8, window_bounds = array<i64: 1, 128>}, {pipeline_mode = #tpu.pipeline_mode<synchronous>, transform_indices = @transform_9, window_bounds = array<i64: 1, 128>}, {pipeline_mode = #tpu.pipeline_mode<synchronous>, transform_indices = @transform_10, window_bounds = array<i64: 128, 128>}, {pipeline_mode = #tpu.pipeline_mode<synchronous>, transform_indices = @transform_11, window_bounds = array<i64: 1, 128>}, {pipeline_mode = #tpu.pipeline_mode<synchronous>, transform_indices = @transform_12, window_bounds = array<i64: 1, 128>}, {pipeline_mode = #tpu.pipeline_mode<synchronous>, transform_indices = @transform_13, window_bounds = array<i64: 1, 128>}, {pipeline_mode = #tpu.pipeline_mode<synchronous>, transform_indices = @transform_14, window_bounds = array<i64: 256, 512>}, {pipeline_mode = #tpu.pipeline_mode<synchronous>, transform_indices = @transform_15, window_bounds = array<i64: 1, 512>}, {pipeline_mode = #tpu.pipeline_mode<synchronous>, transform_indices = @transform_16, window_bounds = array<i64: 1, 128>}, {pipeline_mode = #tpu.pipeline_mode<synchronous>, transform_indices = @transform_17, window_bounds = array<i64: 1, 128>}, {pipeline_mode = #tpu.pipeline_mode<synchronous>, transform_indices = @transform_18, window_bounds = array<i64: 128, 128>}, {pipeline_mode = #tpu.pipeline_mode<synchronous>, transform_indices = @transform_19, window_bounds = array<i64: 1, 128>}, {transform_indices = @transform_20, window_bounds = array<i64: 8, 128>}, {transform_indices = @transform_21, window_bounds = array<i64: 8, 128>}]} {
    %c0 = arith.constant 0 : index
    %c0_0 = arith.constant 0 : index
    %0 = vector.load %arg1[%c0, %c0_0] : memref<8x64xf32, #tpu.memory_space<vmem>>, vector<8x64xf32>
    %c0_1 = arith.constant 0 : index
    %c0_2 = arith.constant 0 : index
    %1 = vector.load %arg5[%c0_1, %c0_2] : memref<1x64xf32, #tpu.memory_space<vmem>>, vector<1x64xf32>
    %c0_3 = arith.constant 0 : index
    %c0_4 = arith.constant 0 : index
    %2 = vector.load %arg6[%c0_3, %c0_4] : memref<1x64xf32, #tpu.memory_space<vmem>>, vector<1x64xf32>
    %cst = arith.constant dense<0.000000e+00> : vector<8xf32>
    %3 = vector.multi_reduction <add>, %0, %cst [1] : vector<8x64xf32> to vector<8xf32>
    %4 = vector.shape_cast %3 : vector<8xf32> to vector<8x1xf32>
    %cst_5 = arith.constant 6.400000e+01 : f32
    %5 = vector.broadcast %cst_5 : f32 to vector<8x1xf32>
    %6 = arith.divf %4, %5 : vector<8x1xf32>
    %7 = vector.broadcast %6 : vector<8x1xf32> to vector<8x64xf32>
    %8 = arith.subf %0, %7 : vector<8x64xf32>
    %9 = arith.mulf %8, %8 : vector<8x64xf32>
    %cst_6 = arith.constant dense<0.000000e+00> : vector<8xf32>
    %10 = vector.multi_reduction <add>, %9, %cst_6 [1] : vector<8x64xf32> to vector<8xf32>
    %11 = vector.shape_cast %10 : vector<8xf32> to vector<8x1xf32>
    %cst_7 = arith.constant 6.400000e+01 : f32
    %12 = vector.broadcast %cst_7 : f32 to vector<8x1xf32>
    %13 = arith.divf %11, %12 : vector<8x1xf32>
    %14 = vector.broadcast %6 : vector<8x1xf32> to vector<8x64xf32>
    %15 = arith.subf %0, %14 : vector<8x64xf32>
    %cst_8 = arith.constant 9.99999974E-6 : f32
    %16 = vector.broadcast %cst_8 : f32 to vector<8x1xf32>
    %17 = arith.addf %13, %16 : vector<8x1xf32>
    %18 = math.rsqrt %17 : vector<8x1xf32>
    %19 = vector.broadcast %18 : vector<8x1xf32> to vector<8x64xf32>
    %20 = arith.mulf %15, %19 : vector<8x64xf32>
    %21 = vector.broadcast %1 : vector<1x64xf32> to vector<8x64xf32>
    %22 = arith.mulf %20, %21 : vector<8x64xf32>
    %23 = vector.broadcast %2 : vector<1x64xf32> to vector<8x64xf32>
    %24 = arith.addf %22, %23 : vector<8x64xf32>
    %25 = arith.truncf %24 : vector<8x64xf32> to vector<8x64xbf16>
    %c0_9 = arith.constant 0 : index
    %c0_10 = arith.constant 0 : index
    %26 = vector.load %arg7[%c0_9, %c0_10] : memref<64x128xbf16, #tpu.memory_space<vmem>>, vector<64x128xbf16>
    %cst_11 = arith.constant dense<0.000000e+00> : vector<8x128xf32>
    %27 = tpu.matmul %25, %26, %cst_11 {dimension_numbers = #tpu.dot_dimension_numbers<[1], [0], [0], [1], [0, 0, 1, 1], [], []>} : vector<8x64xbf16>, vector<64x128xbf16>, vector<8x128xf32> -> vector<8x128xf32>
    %c0_12 = arith.constant 0 : index
    %c0_13 = arith.constant 0 : index
    %28 = vector.load %arg8[%c0_12, %c0_13] : memref<1x128xf32, #tpu.memory_space<vmem>>, vector<1x128xf32>
    %29 = vector.broadcast %28 : vector<1x128xf32> to vector<8x128xf32>
    %30 = arith.addf %27, %29 : vector<8x128xf32>
    %cst_14 = arith.constant 0.000000e+00 : f32
    %31 = vector.broadcast %cst_14 : f32 to vector<8x128xf32>
    %32 = arith.maximumf %30, %31 : vector<8x128xf32>
    %c0_15 = arith.constant 0 : index
    %c0_16 = arith.constant 0 : index
    %33 = vector.load %arg9[%c0_15, %c0_16] : memref<1x128xf32, #tpu.memory_space<vmem>>, vector<1x128xf32>
    %c0_17 = arith.constant 0 : index
    %c0_18 = arith.constant 0 : index
    %34 = vector.load %arg10[%c0_17, %c0_18] : memref<1x128xf32, #tpu.memory_space<vmem>>, vector<1x128xf32>
    %cst_19 = arith.constant dense<0.000000e+00> : vector<8xf32>
    %35 = vector.multi_reduction <add>, %32, %cst_19 [1] : vector<8x128xf32> to vector<8xf32>
    %36 = vector.shape_cast %35 : vector<8xf32> to vector<8x1xf32>
    %cst_20 = arith.constant 1.280000e+02 : f32
    %37 = vector.broadcast %cst_20 : f32 to vector<8x1xf32>
    %38 = arith.divf %36, %37 : vector<8x1xf32>
    %39 = vector.broadcast %38 : vector<8x1xf32> to vector<8x128xf32>
    %40 = arith.subf %32, %39 : vector<8x128xf32>
    %41 = arith.mulf %40, %40 : vector<8x128xf32>
    %cst_21 = arith.constant dense<0.000000e+00> : vector<8xf32>
    %42 = vector.multi_reduction <add>, %41, %cst_21 [1] : vector<8x128xf32> to vector<8xf32>
    %43 = vector.shape_cast %42 : vector<8xf32> to vector<8x1xf32>
    %cst_22 = arith.constant 1.280000e+02 : f32
    %44 = vector.broadcast %cst_22 : f32 to vector<8x1xf32>
    %45 = arith.divf %43, %44 : vector<8x1xf32>
    %46 = vector.broadcast %38 : vector<8x1xf32> to vector<8x128xf32>
    %47 = arith.subf %32, %46 : vector<8x128xf32>
    %cst_23 = arith.constant 9.99999974E-6 : f32
    %48 = vector.broadcast %cst_23 : f32 to vector<8x1xf32>
    %49 = arith.addf %45, %48 : vector<8x1xf32>
    %50 = math.rsqrt %49 : vector<8x1xf32>
    %51 = vector.broadcast %50 : vector<8x1xf32> to vector<8x128xf32>
    %52 = arith.mulf %47, %51 : vector<8x128xf32>
    %53 = vector.broadcast %33 : vector<1x128xf32> to vector<8x128xf32>
    %54 = arith.mulf %52, %53 : vector<8x128xf32>
    %55 = vector.broadcast %34 : vector<1x128xf32> to vector<8x128xf32>
    %56 = arith.addf %54, %55 : vector<8x128xf32>
    %57 = arith.truncf %56 : vector<8x128xf32> to vector<8x128xbf16>
    %c0_24 = arith.constant 0 : index
    %c0_25 = arith.constant 0 : index
    %58 = vector.load %arg11[%c0_24, %c0_25] : memref<128x128xbf16, #tpu.memory_space<vmem>>, vector<128x128xbf16>
    %cst_26 = arith.constant dense<0.000000e+00> : vector<8x128xf32>
    %59 = tpu.matmul %57, %58, %cst_26 {dimension_numbers = #tpu.dot_dimension_numbers<[1], [0], [0], [1], [0, 0, 1, 1], [], []>} : vector<8x128xbf16>, vector<128x128xbf16>, vector<8x128xf32> -> vector<8x128xf32>
    %c0_27 = arith.constant 0 : index
    %c0_28 = arith.constant 0 : index
    %60 = vector.load %arg12[%c0_27, %c0_28] : memref<1x128xf32, #tpu.memory_space<vmem>>, vector<1x128xf32>
    %61 = vector.broadcast %60 : vector<1x128xf32> to vector<8x128xf32>
    %62 = arith.addf %59, %61 : vector<8x128xf32>
    %cst_29 = arith.constant 0.000000e+00 : f32
    %63 = vector.broadcast %cst_29 : f32 to vector<8x128xf32>
    %64 = arith.maximumf %62, %63 : vector<8x128xf32>
    %c0_30 = arith.constant 0 : index
    %c0_31 = arith.constant 0 : index
    %65 = vector.load %arg13[%c0_30, %c0_31] : memref<1x128xf32, #tpu.memory_space<vmem>>, vector<1x128xf32>
    %c0_32 = arith.constant 0 : index
    %c0_33 = arith.constant 0 : index
    %66 = vector.load %arg14[%c0_32, %c0_33] : memref<1x128xf32, #tpu.memory_space<vmem>>, vector<1x128xf32>
    %cst_34 = arith.constant dense<0.000000e+00> : vector<8xf32>
    %67 = vector.multi_reduction <add>, %64, %cst_34 [1] : vector<8x128xf32> to vector<8xf32>
    %68 = vector.shape_cast %67 : vector<8xf32> to vector<8x1xf32>
    %cst_35 = arith.constant 1.280000e+02 : f32
    %69 = vector.broadcast %cst_35 : f32 to vector<8x1xf32>
    %70 = arith.divf %68, %69 : vector<8x1xf32>
    %71 = vector.broadcast %70 : vector<8x1xf32> to vector<8x128xf32>
    %72 = arith.subf %64, %71 : vector<8x128xf32>
    %73 = arith.mulf %72, %72 : vector<8x128xf32>
    %cst_36 = arith.constant dense<0.000000e+00> : vector<8xf32>
    %74 = vector.multi_reduction <add>, %73, %cst_36 [1] : vector<8x128xf32> to vector<8xf32>
    %75 = vector.shape_cast %74 : vector<8xf32> to vector<8x1xf32>
    %cst_37 = arith.constant 1.280000e+02 : f32
    %76 = vector.broadcast %cst_37 : f32 to vector<8x1xf32>
    %77 = arith.divf %75, %76 : vector<8x1xf32>
    %78 = vector.broadcast %70 : vector<8x1xf32> to vector<8x128xf32>
    %79 = arith.subf %64, %78 : vector<8x128xf32>
    %cst_38 = arith.constant 9.99999974E-6 : f32
    %80 = vector.broadcast %cst_38 : f32 to vector<8x1xf32>
    %81 = arith.addf %77, %80 : vector<8x1xf32>
    %82 = math.rsqrt %81 : vector<8x1xf32>
    %83 = vector.broadcast %82 : vector<8x1xf32> to vector<8x128xf32>
    %84 = arith.mulf %79, %83 : vector<8x128xf32>
    %85 = vector.broadcast %65 : vector<1x128xf32> to vector<8x128xf32>
    %86 = arith.mulf %84, %85 : vector<8x128xf32>
    %87 = vector.broadcast %66 : vector<1x128xf32> to vector<8x128xf32>
    %88 = arith.addf %86, %87 : vector<8x128xf32>
    %c0_39 = arith.constant 0 : index
    %c0_40 = arith.constant 0 : index
    %89 = vector.load %arg2[%c0_39, %c0_40] : memref<8x128xf32, #tpu.memory_space<vmem>>, vector<8x128xf32>
    %c0_41 = arith.constant 0 : index
    %c0_42 = arith.constant 0 : index
    %90 = vector.load %arg3[%c0_41, %c0_42] : memref<8x1xf32, #tpu.memory_space<vmem>>, vector<8x1xf32>
    %91 = vector.broadcast %90 : vector<8x1xf32> to vector<8x128xf32>
    %92 = arith.mulf %89, %91 : vector<8x128xf32>
    %93 = arith.truncf %88 : vector<8x128xf32> to vector<8x128xbf16>
    %94 = arith.truncf %92 : vector<8x128xf32> to vector<8x128xbf16>
    %95 = tpu.concatenate %93, %94 in 1 : vector<8x128xbf16>, vector<8x128xbf16> -> vector<8x256xbf16>
    %c0_43 = arith.constant 0 : index
    %c0_44 = arith.constant 0 : index
    %96 = vector.load %arg15[%c0_43, %c0_44] : memref<256x512xbf16, #tpu.memory_space<vmem>>, vector<256x512xbf16>
    %cst_45 = arith.constant dense<0.000000e+00> : vector<8x512xf32>
    %97 = tpu.matmul %95, %96, %cst_45 {dimension_numbers = #tpu.dot_dimension_numbers<[1], [0], [0], [1], [0, 0, 1, 1], [], []>} : vector<8x256xbf16>, vector<256x512xbf16>, vector<8x512xf32> -> vector<8x512xf32>
    %c0_46 = arith.constant 0 : index
    %c0_47 = arith.constant 0 : index
    %98 = vector.load %arg16[%c0_46, %c0_47] : memref<1x512xf32, #tpu.memory_space<vmem>>, vector<1x512xf32>
    %99 = vector.broadcast %98 : vector<1x512xf32> to vector<8x512xf32>
    %100 = arith.addf %97, %99 : vector<8x512xf32>
    %101 = vector.extract_strided_slice %100 {offsets = [0, 0], sizes = [8, 128], strides = [1, 1]} : vector<8x512xf32> to vector<8x128xf32>
    %102 = arith.negf %101 : vector<8x128xf32>
    %103 = math.exp %102 : vector<8x128xf32>
    %cst_48 = arith.constant 1.000000e+00 : f32
    %104 = vector.broadcast %cst_48 : f32 to vector<8x128xf32>
    %105 = arith.addf %104, %103 : vector<8x128xf32>
    %106 = arith.divf %104, %105 : vector<8x128xf32>
    %107 = vector.extract_strided_slice %100 {offsets = [0, 128], sizes = [8, 128], strides = [1, 1]} : vector<8x512xf32> to vector<8x128xf32>
    %108 = arith.negf %107 : vector<8x128xf32>
    %109 = math.exp %108 : vector<8x128xf32>
    %cst_49 = arith.constant 1.000000e+00 : f32
    %110 = vector.broadcast %cst_49 : f32 to vector<8x128xf32>
    %111 = arith.addf %110, %109 : vector<8x128xf32>
    %112 = arith.divf %110, %111 : vector<8x128xf32>
    %113 = vector.extract_strided_slice %100 {offsets = [0, 256], sizes = [8, 128], strides = [1, 1]} : vector<8x512xf32> to vector<8x128xf32>
    %114 = vector.extract_strided_slice %100 {offsets = [0, 384], sizes = [8, 128], strides = [1, 1]} : vector<8x512xf32> to vector<8x128xf32>
    %115 = arith.mulf %106, %114 : vector<8x128xf32>
    %116 = arith.addf %113, %115 : vector<8x128xf32>
    %117 = math.tanh %116 : vector<8x128xf32>
    %cst_50 = arith.constant 1.000000e+00 : f32
    %118 = vector.broadcast %cst_50 : f32 to vector<8x128xf32>
    %119 = arith.subf %118, %112 : vector<8x128xf32>
    %120 = arith.mulf %119, %117 : vector<8x128xf32>
    %121 = arith.mulf %112, %92 : vector<8x128xf32>
    %122 = arith.addf %120, %121 : vector<8x128xf32>
    %c0_51 = arith.constant 0 : index
    %c0_52 = arith.constant 0 : index
    %123 = vector.load %arg22[%c0_51, %c0_52] : memref<8x128xf32, #tpu.memory_space<vmem>>, vector<8x128xf32>
    tpu.vector_store %arg22[%c0_51, %c0_52], %122 {strides = array<i32>} : memref<8x128xf32, #tpu.memory_space<vmem>>, vector<8x128xf32>,
    %c0_53 = arith.constant 0 : index
    %c0_54 = arith.constant 0 : index
    %124 = vector.load %arg17[%c0_53, %c0_54] : memref<1x128xf32, #tpu.memory_space<vmem>>, vector<1x128xf32>
    %c0_55 = arith.constant 0 : index
    %c0_56 = arith.constant 0 : index
    %125 = vector.load %arg18[%c0_55, %c0_56] : memref<1x128xf32, #tpu.memory_space<vmem>>, vector<1x128xf32>
    %cst_57 = arith.constant dense<0.000000e+00> : vector<8xf32>
    %126 = vector.multi_reduction <add>, %122, %cst_57 [1] : vector<8x128xf32> to vector<8xf32>
    %127 = vector.shape_cast %126 : vector<8xf32> to vector<8x1xf32>
    %cst_58 = arith.constant 1.280000e+02 : f32
    %128 = vector.broadcast %cst_58 : f32 to vector<8x1xf32>
    %129 = arith.divf %127, %128 : vector<8x1xf32>
    %130 = vector.broadcast %129 : vector<8x1xf32> to vector<8x128xf32>
    %131 = arith.subf %122, %130 : vector<8x128xf32>
    %132 = arith.mulf %131, %131 : vector<8x128xf32>
    %cst_59 = arith.constant dense<0.000000e+00> : vector<8xf32>
    %133 = vector.multi_reduction <add>, %132, %cst_59 [1] : vector<8x128xf32> to vector<8xf32>
    %134 = vector.shape_cast %133 : vector<8xf32> to vector<8x1xf32>
    %cst_60 = arith.constant 1.280000e+02 : f32
    %135 = vector.broadcast %cst_60 : f32 to vector<8x1xf32>
    %136 = arith.divf %134, %135 : vector<8x1xf32>
    %137 = vector.broadcast %129 : vector<8x1xf32> to vector<8x128xf32>
    %138 = arith.subf %122, %137 : vector<8x128xf32>
    %cst_61 = arith.constant 9.99999974E-6 : f32
    %139 = vector.broadcast %cst_61 : f32 to vector<8x1xf32>
    %140 = arith.addf %136, %139 : vector<8x1xf32>
    %141 = math.rsqrt %140 : vector<8x1xf32>
    %142 = vector.broadcast %141 : vector<8x1xf32> to vector<8x128xf32>
    %143 = arith.mulf %138, %142 : vector<8x128xf32>
    %144 = vector.broadcast %124 : vector<1x128xf32> to vector<8x128xf32>
    %145 = arith.mulf %143, %144 : vector<8x128xf32>
    %146 = vector.broadcast %125 : vector<1x128xf32> to vector<8x128xf32>
    %147 = arith.addf %145, %146 : vector<8x128xf32>
    %148 = arith.truncf %147 : vector<8x128xf32> to vector<8x128xbf16>
    %c0_62 = arith.constant 0 : index
    %c0_63 = arith.constant 0 : index
    %149 = vector.load %arg19[%c0_62, %c0_63] : memref<128x128xbf16, #tpu.memory_space<vmem>>, vector<128x128xbf16>
    %cst_64 = arith.constant dense<0.000000e+00> : vector<8x128xf32>
    %150 = tpu.matmul %148, %149, %cst_64 {dimension_numbers = #tpu.dot_dimension_numbers<[1], [0], [0], [1], [0, 0, 1, 1], [], []>} : vector<8x128xbf16>, vector<128x128xbf16>, vector<8x128xf32> -> vector<8x128xf32>
    %c0_65 = arith.constant 0 : index
    %c0_66 = arith.constant 0 : index
    %151 = vector.load %arg20[%c0_65, %c0_66] : memref<1x128xf32, #tpu.memory_space<vmem>>, vector<1x128xf32>
    %152 = vector.broadcast %151 : vector<1x128xf32> to vector<8x128xf32>
    %153 = arith.addf %150, %152 : vector<8x128xf32>
    %c0_67 = arith.constant 0 : index
    %c0_68 = arith.constant 0 : index
    %154 = vector.load %arg4[%c0_67, %c0_68] : memref<8x128xf32, #tpu.memory_space<vmem>>, vector<8x128xf32>
    %cst_69 = arith.constant 0.000000e+00 : f32
    %155 = vector.broadcast %cst_69 : f32 to vector<8x128xf32>
    %156 = arith.cmpf ogt, %154, %155 : vector<8x128xf32>
    %cst_70 = arith.constant -1.000000e+10 : f32
    %157 = vector.broadcast %cst_70 : f32 to vector<8x128xf32>
    %158 = arith.select %156, %153, %157 : vector<8x128xi1>, vector<8x128xf32>
    %cst_71 = arith.constant dense<0xFF800000> : vector<8xf32>
    %159 = vector.multi_reduction <maximumf>, %158, %cst_71 [1] : vector<8x128xf32> to vector<8xf32>
    %160 = vector.shape_cast %159 : vector<8xf32> to vector<8x1xf32>
    %161 = tpu.iota {dimensions = array<i32: 1>} : vector<8x128xi32>
    %162 = vector.broadcast %160 : vector<8x1xf32> to vector<8x128xf32>
    %163 = arith.cmpf oge, %158, %162 : vector<8x128xf32>
    %c128_i32 = arith.constant 128 : i32
    %164 = vector.broadcast %c128_i32 : i32 to vector<8x128xi32>
    %165 = arith.select %163, %161, %164 : vector<8x128xi1>, vector<8x128xi32>
    %cst_72 = arith.constant dense<2147483647> : vector<8xi32>
    %166 = vector.multi_reduction <minsi>, %165, %cst_72 [1] : vector<8x128xi32> to vector<8xi32>
    %167 = vector.shape_cast %166 : vector<8xi32> to vector<8x1xi32>
    %168 = vector.broadcast %160 : vector<8x1xf32> to vector<8x128xf32>
    %169 = arith.subf %158, %168 : vector<8x128xf32>
    %170 = math.exp %169 : vector<8x128xf32>
    %cst_73 = arith.constant dense<0.000000e+00> : vector<8xf32>
    %171 = vector.multi_reduction <add>, %170, %cst_73 [1] : vector<8x128xf32> to vector<8xf32>
    %172 = vector.shape_cast %171 : vector<8xf32> to vector<8x1xf32>
    %173 = math.log %172 : vector<8x1xf32>
    %174 = arith.addf %160, %173 : vector<8x1xf32>
    %175 = arith.subf %160, %174 : vector<8x1xf32>
    %176 = tpu.iota {dimensions = array<i32: 1>} : vector<8x128xi32>
    %c0_i32 = arith.constant 0 : i32
    %177 = vector.broadcast %c0_i32 : i32 to vector<8x128xi32>
    %178 = arith.cmpi eq, %176, %177 : vector<8x128xi32>
    %179 = arith.sitofp %167 : vector<8x1xi32> to vector<8x1xf32>
    %c1_i32 = arith.constant 1 : i32
    %180 = vector.broadcast %c1_i32 : i32 to vector<8x128xi32>
    %181 = arith.cmpi eq, %176, %180 : vector<8x128xi32>
    %cst_74 = arith.constant 0.000000e+00 : f32
    %182 = vector.shape_cast %175 : vector<8x1xf32> to vector<8x1xf32>
    %183 = vector.broadcast %182 : vector<8x1xf32> to vector<8x128xf32>
    %184 = vector.broadcast %cst_74 : f32 to vector<8x128xf32>
    %185 = arith.select %181, %183, %184 : vector<8x128xi1>, vector<8x128xf32>
    %186 = vector.shape_cast %179 : vector<8x1xf32> to vector<8x1xf32>
    %187 = vector.broadcast %186 : vector<8x1xf32> to vector<8x128xf32>
    %188 = arith.select %178, %187, %185 : vector<8x128xi1>, vector<8x128xf32>
    %c0_75 = arith.constant 0 : index
    %c0_76 = arith.constant 0 : index
    %189 = vector.load %arg21[%c0_75, %c0_76] : memref<8x128xf32, #tpu.memory_space<vmem>>, vector<8x128xf32>
    tpu.vector_store %arg21[%c0_75, %c0_76], %188 {strides = array<i32>} : memref<8x128xf32, #tpu.memory_space<vmem>>, vector<8x128xf32>,
    return
  }
  func.func @transform_0(%arg0: i32) -> (i32, i32) {
    %c0_i32 = arith.constant 0 : i32
    %c0_i32_0 = arith.constant 0 : i32
    return %arg0, %c0_i32 : i32, i32
  }
  func.func @transform_1(%arg0: i32) -> (i32, i32) {
    %c0_i32 = arith.constant 0 : i32
    %c0_i32_0 = arith.constant 0 : i32
    return %arg0, %c0_i32 : i32, i32
  }
  func.func @transform_2(%arg0: i32) -> (i32, i32) {
    %c0_i32 = arith.constant 0 : i32
    %c0_i32_0 = arith.constant 0 : i32
    return %arg0, %c0_i32 : i32, i32
  }
  func.func @transform_3(%arg0: i32) -> (i32, i32) {
    %c0_i32 = arith.constant 0 : i32
    %c0_i32_0 = arith.constant 0 : i32
    return %arg0, %c0_i32 : i32, i32
  }
  func.func @transform_4(%arg0: i32) -> (i32, i32) {
    %c0_i32 = arith.constant 0 : i32
    %c0_i32_0 = arith.constant 0 : i32
    %c0_i32_1 = arith.constant 0 : i32
    return %c0_i32, %c0_i32_0 : i32, i32
  }
  func.func @transform_5(%arg0: i32) -> (i32, i32) {
    %c0_i32 = arith.constant 0 : i32
    %c0_i32_0 = arith.constant 0 : i32
    %c0_i32_1 = arith.constant 0 : i32
    return %c0_i32, %c0_i32_0 : i32, i32
  }
  func.func @transform_6(%arg0: i32) -> (i32, i32) {
    %c0_i32 = arith.constant 0 : i32
    %c0_i32_0 = arith.constant 0 : i32
    %c0_i32_1 = arith.constant 0 : i32
    return %c0_i32, %c0_i32_0 : i32, i32
  }
  func.func @transform_7(%arg0: i32) -> (i32, i32) {
    %c0_i32 = arith.constant 0 : i32
    %c0_i32_0 = arith.constant 0 : i32
    %c0_i32_1 = arith.constant 0 : i32
    return %c0_i32, %c0_i32_0 : i32, i32
  }
  func.func @transform_8(%arg0: i32) -> (i32, i32) {
    %c0_i32 = arith.constant 0 : i32
    %c0_i32_0 = arith.constant 0 : i32
    %c0_i32_1 = arith.constant 0 : i32
    return %c0_i32, %c0_i32_0 : i32, i32
  }
  func.func @transform_9(%arg0: i32) -> (i32, i32) {
    %c0_i32 = arith.constant 0 : i32
    %c0_i32_0 = arith.constant 0 : i32
    %c0_i32_1 = arith.constant 0 : i32
    return %c0_i32, %c0_i32_0 : i32, i32
  }
  func.func @transform_10(%arg0: i32) -> (i32, i32) {
    %c0_i32 = arith.constant 0 : i32
    %c0_i32_0 = arith.constant 0 : i32
    %c0_i32_1 = arith.constant 0 : i32
    return %c0_i32, %c0_i32_0 : i32, i32
  }
  func.func @transform_11(%arg0: i32) -> (i32, i32) {
    %c0_i32 = arith.constant 0 : i32
    %c0_i32_0 = arith.constant 0 : i32
    %c0_i32_1 = arith.constant 0 : i32
    return %c0_i32, %c0_i32_0 : i32, i32
  }
  func.func @transform_12(%arg0: i32) -> (i32, i32) {
    %c0_i32 = arith.constant 0 : i32
    %c0_i32_0 = arith.constant 0 : i32
    %c0_i32_1 = arith.constant 0 : i32
    return %c0_i32, %c0_i32_0 : i32, i32
  }
  func.func @transform_13(%arg0: i32) -> (i32, i32) {
    %c0_i32 = arith.constant 0 : i32
    %c0_i32_0 = arith.constant 0 : i32
    %c0_i32_1 = arith.constant 0 : i32
    return %c0_i32, %c0_i32_0 : i32, i32
  }
  func.func @transform_14(%arg0: i32) -> (i32, i32) {
    %c0_i32 = arith.constant 0 : i32
    %c0_i32_0 = arith.constant 0 : i32
    %c0_i32_1 = arith.constant 0 : i32
    return %c0_i32, %c0_i32_0 : i32, i32
  }
  func.func @transform_15(%arg0: i32) -> (i32, i32) {
    %c0_i32 = arith.constant 0 : i32
    %c0_i32_0 = arith.constant 0 : i32
    %c0_i32_1 = arith.constant 0 : i32
    return %c0_i32, %c0_i32_0 : i32, i32
  }
  func.func @transform_16(%arg0: i32) -> (i32, i32) {
    %c0_i32 = arith.constant 0 : i32
    %c0_i32_0 = arith.constant 0 : i32
    %c0_i32_1 = arith.constant 0 : i32
    return %c0_i32, %c0_i32_0 : i32, i32
  }
  func.func @transform_17(%arg0: i32) -> (i32, i32) {
    %c0_i32 = arith.constant 0 : i32
    %c0_i32_0 = arith.constant 0 : i32
    %c0_i32_1 = arith.constant 0 : i32
    return %c0_i32, %c0_i32_0 : i32, i32
  }
  func.func @transform_18(%arg0: i32) -> (i32, i32) {
    %c0_i32 = arith.constant 0 : i32
    %c0_i32_0 = arith.constant 0 : i32
    %c0_i32_1 = arith.constant 0 : i32
    return %c0_i32, %c0_i32_0 : i32, i32
  }
  func.func @transform_19(%arg0: i32) -> (i32, i32) {
    %c0_i32 = arith.constant 0 : i32
    %c0_i32_0 = arith.constant 0 : i32
    %c0_i32_1 = arith.constant 0 : i32
    return %c0_i32, %c0_i32_0 : i32, i32
  }
  func.func @transform_20(%arg0: i32) -> (i32, i32) {
    %c0_i32 = arith.constant 0 : i32
    %c0_i32_0 = arith.constant 0 : i32
    return %arg0, %c0_i32 : i32, i32
  }
  func.func @transform_21(%arg0: i32) -> (i32, i32) {
    %c0_i32 = arith.constant 0 : i32
    %c0_i32_0 = arith.constant 0 : i32
    return %arg0, %c0_i32 : i32, i32
  }
}

</mosaic_0001>

<bundles_post_ra>
// kernel: tpu_custom_call.1
= control target key start
LH: loop header
LB: loop body
LE: loop exit
PB: predicated region body
PF: predicated region fallthrough
CT: control target
= control target key end

     0   :  { %s1906_s0 = inlined_call_operand.vmem [shape: f32[8,64], index: 0, kind: input, shape index: {}]   ;;  %s1907_s1 = inlined_call_operand.hbm [shape: f32[8,128], index: 1, kind: input, shape index: {}]   ;;  %s1908_s2 = inlined_call_operand.vmem [shape: f32[8,1], index: 2, kind: input, shape index: {}]   ;;  %s1909_s3 = inlined_call_operand.hbm [shape: f32[8,128], index: 3, kind: input, shape index: {}]   ;;  %s1910_s4 = inlined_call_operand.vmem [shape: f32[1,64], index: 4, kind: input, shape index: {}]   ;;  %s1911_s5 = inlined_call_operand.vmem [shape: f32[1,64], index: 5, kind: input, shape index: {}]   ;;  %s1912_s6 = inlined_call_operand.hbm [shape: bf16[64,128], index: 6, kind: input, shape index: {}]   ;;  %s1913_s7 = inlined_call_operand.vmem [shape: f32[1,128], index: 7, kind: input, shape index: {}]   ;;  %s1914_s8 = inlined_call_operand.vmem [shape: f32[1,128], index: 8, kind: input, shape index: {}]   ;;  %s1915_s9 = inlined_call_operand.vmem [shape: f32[1,128], index: 9, kind: input, shape index: {}]   ;;  %s1916_s10 = inlined_call_operand.hbm [shape: bf16[128,128], index: 10, kind: input, shape index: {}]   ;;  %s1917_s11 = inlined_call_operand.vmem [shape: f32[1,128], index: 11, kind: input, shape index: {}]   ;;  %s1918_s12 = inlined_call_operand.vmem [shape: f32[1,128], index: 12, kind: input, shape index: {}]   ;;  %s1919_s13 = inlined_call_operand.vmem [shape: f32[1,128], index: 13, kind: input, shape index: {}]   ;;  %s1920_s14 = inlined_call_operand.hbm [shape: bf16[256,512], index: 14, kind: input, shape index: {}]   ;;  %s1921_s15 = inlined_call_operand.vmem [shape: f32[1,512], index: 15, kind: input, shape index: {}]   ;;  %s1922_s16 = inlined_call_operand.vmem [shape: f32[1,128], index: 16, kind: input, shape index: {}]   ;;  %s1923_s17 = inlined_call_operand.vmem [shape: f32[1,128], index: 17, kind: input, shape index: {}]   ;;  %s1924_s18 = inlined_call_operand.hbm [shape: bf16[128,128], index: 18, kind: input, shape index: {}]   ;;  %s1925_s19 = inlined_call_operand.vmem [shape: f32[1,128], index: 19, kind: input, shape index: {}]   ;;  %s1926_s20 = inlined_call_operand.hbm [shape: f32[8,128], index: 20, kind: output, shape index: {0}]   ;;  %s1927_s21 = inlined_call_operand.hbm [shape: f32[8,128], index: 21, kind: output, shape index: {1}]  }
   0x1   :  { %1928 = sst [smem:[#allocation22_spill]] %s1906_s0 }
   0x2   :  { %1929 = sst [smem:[#allocation23_spill]] %s1907_s1 }
   0x3   :  { %1930 = sst [smem:[#allocation24_spill]] %s1908_s2 }
   0x4   :  { %1931 = sst [smem:[#allocation25_spill]] %s1909_s3 }
   0x5   :  { %1932 = sst [smem:[#allocation26_spill]] %s1910_s4 }
   0x6   :  { %1933 = sst [smem:[#allocation27_spill]] %s1911_s5 }
   0x7   :  { %27 = vsyncpa [#allocation3], 0 }
   0x8   :  { %28 = vsyncpa [#allocation6], 0 }
   0x9   :  { %29 = vsyncpa [#allocation9], 0 }
   0xa   :  { %30 = vsyncpa [#allocation12], 0 }
   0xb   :  { %31 = vsyncpa [#allocation4], 0 }
   0xc   :  { %32 = vsyncpa [#allocation15], 0  ;;  %s1658_s2 = smov [#allocation5]  }
   0xd   :  { %s53_s25 = sshll.u32 %s1658_s2, 4  ;;  %s54_s25 = int_to_ptr.vmem [resolvable:$true] %s53_s25 }
   0xe   :  { %s1494_s26 = scalar_lea.vmem %s54_s25, 128  ;;  %p1499_p1 = scmp.lt.s32.totalorder %s54_s25, %s54_s25 }
   0xf   :  { %p1495_p0 = scmp.ne.s32.totalorder %s54_s25, %s1494_s26  ;;  %p1500_p2 = scmp.lt.s32.totalorder %s1494_s26, %s1494_s26 }
  0x11   :  { %p1501_p3 = por %p1500_p2, %p1499_p1 }
  0x13   :  { %p1502_p4 = pnand %p1501_p3, %p1495_p0 }
  0x15   :  { %1505 = shalt.err (!%p1502_p4)
}
  0x16   :  { %s1934_s28 = sld [smem:[#allocation25_spill]]  ;;  %s1659_s29 = smov [#allocation8]  }
  0x17   :  { %s84_s0 = sshll.u32 %s1659_s29, 4  ;;  %s1660_s4 = smov [#allocation2]   ;;  %s85_s0 = int_to_ptr.vmem [resolvable:$true] %s84_s0 }
  0x18   :  { %s41_s30 = sshll.u32 %s1660_s4, 4  ;;  %s1514_s5 = scalar_lea.vmem %s85_s0, 1024  ;;  %s42_s30 = int_to_ptr.vmem [resolvable:$true] %s41_s30 }
  0x19   :  { %p1515_p5 = scmp.ne.s32.totalorder %s85_s0, %s1514_s5  ;;  %p1519_p6 = scmp.lt.s32.totalorder %s85_s0, %s85_s0 }
  0x1a   :  { %p1520_p7 = scmp.lt.s32.totalorder %s1514_s5, %s1514_s5 }
  0x1c   :  { %56 = dma.hbm_to_vmem [thread:$0]  %s1934_s28, 128, %s54_s25, [#allocation6]  }
  0x1d   :  { %p1521_p8 = por %p1520_p7, %p1519_p6 }
  0x1f   :  { %p1522_p9 = pnand %p1521_p8, %p1515_p5 }
  0x21   :  { %1525 = shalt.err (!%p1522_p9)
}
  0x22   :  { %s1661_s22 = smov 64   ;;  %s1662_s23 = smov 4  }
  0x23   :  { %90 = dma.hbm_to_vmem [thread:$0]  %s1916_s10, 1024, %s85_s0, [#allocation9], %s1661_s22, %s1661_s22, %s1662_s23  }
  0x24   :  { %s1534_s2 = scalar_lea.vmem %s42_s30, 128  ;;  %p1539_p11 = scmp.lt.s32.totalorder %s42_s30, %s42_s30 }
  0x25   :  { %p1535_p10 = scmp.ne.s32.totalorder %s42_s30, %s1534_s2  ;;  %p1540_p12 = scmp.lt.s32.totalorder %s1534_s2, %s1534_s2 }
  0x27   :  { %p1541_p13 = por %p1540_p12, %p1539_p11 }
  0x29   :  { %p1542_p0 = pnand %p1541_p13, %p1535_p10 }
  0x2b   :  { %1545 = shalt.err (!%p1542_p0)
}
  0x2c   :  { %s1935_s27 = sld [smem:[#allocation23_spill]]  ;;  %s1663_s3 = smov [#allocation7]  }
  0x2d   :  { %s66_s28 = sshll.u32 %s1663_s3, 4  ;;  %s1664_s29 = smov [#allocation10]   ;;  %s67_s28 = int_to_ptr.vmem [resolvable:$true] %s66_s28 }
  0x2e   :  { %s102_s4 = sshll.u32 %s1664_s29, 4  ;;  %s1554_s5 = scalar_lea.vmem %s67_s28, 512  ;;  %s103_s4 = int_to_ptr.vmem [resolvable:$true] %s102_s4 }
  0x2f   :  { %p1555_p1 = scmp.ne.s32.totalorder %s67_s28, %s1554_s5  ;;  %p1559_p2 = scmp.lt.s32.totalorder %s67_s28, %s67_s28 }
  0x30   :  { %p1560_p3 = scmp.lt.s32.totalorder %s1554_s5, %s1554_s5 }
  0x32   :  { %44 = dma.hbm_to_vmem [thread:$0]  %s1935_s27, 128, %s42_s30, [#allocation3]  }
  0x33   :  { %p1561_p4 = por %p1560_p3, %p1559_p2 }
  0x35   :  { %p1562_p5 = pnand %p1561_p4, %p1555_p1 }
  0x37   :  { %1565 = shalt.err (!%p1562_p5)
}
  0x38   :  { %72 = dma.hbm_to_vmem [thread:$0]  %s1912_s6, 512, %s67_s28, [#allocation6], %s1661_s22, %s1661_s22, %s1662_s23  }
  0x39   :  { %s1574_s30 = scalar_lea.vmem %s103_s4, 8192  ;;  %p1579_p7 = scmp.lt.s32.totalorder %s103_s4, %s103_s4 }
  0x3a   :  { %p1575_p6 = scmp.ne.s32.totalorder %s103_s4, %s1574_s30  ;;  %p1580_p8 = scmp.lt.s32.totalorder %s1574_s30, %s1574_s30 }
  0x3c   :  { %p1581_p9 = por %p1580_p8, %p1579_p7 }
  0x3e   :  { %p1582_p10 = pnand %p1581_p9, %p1575_p6 }
  0x40   :  { %1585 = shalt.err (!%p1582_p10)
}
  0x41   :  { %s1665_s1 = smov 256   ;;  %s1666_s24 = smov 16  }
  0x42   :  { %108 = dma.hbm_to_vmem [thread:$0]  %s1920_s14, 8192, %s103_s4, [#allocation9], %s1665_s1, %s1665_s1, %s1666_s24  }
  0x43   :  { %s1667_s26 = smov [#allocation11]  }
  0x44   :  { %s120_s27 = sshll.u32 %s1667_s26, 4  ;;  %s121_s27 = int_to_ptr.vmem [resolvable:$true] %s120_s27 }
  0x45   :  { %s1594_s3 = scalar_lea.vmem %s121_s27, 1024  ;;  %p1599_p12 = scmp.lt.s32.totalorder %s121_s27, %s121_s27 }
  0x46   :  { %p1595_p11 = scmp.ne.s32.totalorder %s121_s27, %s1594_s3  ;;  %p1600_p13 = scmp.lt.s32.totalorder %s1594_s3, %s1594_s3 }
  0x48   :  { %p1601_p0 = por %p1600_p13, %p1599_p12 }
  0x4a   :  { %p1602_p1 = pnand %p1601_p0, %p1595_p11 }
  0x4c   :  { %1605 = shalt.err (!%p1602_p1)
}
  0x4d   :  { %126 = dma.hbm_to_vmem [thread:$0]  %s1924_s18, 1024, %s121_s27, [#allocation12], %s1661_s22, %s1661_s22, %s1662_s23  }
  0x4e   :  { %1646 = dma.done.wait [#allocation3], 128  }
  0x4f   :  { %1647 = vsyncadd [#allocation3], 4294967168 }
  0x50   :  { %1648 = dma.done.wait [#allocation6], 640  }
  0x51   :  { %1649 = vsyncadd [#allocation6], 4294966656 }
  0x52   :  { %1650 = dma.done.wait [#allocation9], 9216  }
  0x53   :  { %1651 = vsyncadd [#allocation9], 4294958080 }
  0x54   :  { %1652 = dma.done.wait [#allocation12], 1024  }
  0x55   :  { %1653 = vsyncadd [#allocation12], 4294966272  ;;  %vm151_vm0 = vcmask 523264   ;;  %s1936_s4 = sld [smem:[#allocation22_spill]]  ;;  %v1348_v7 = vld [vmem:[#allocation7 + $0x18] sm:$0xff]   ;;  %v1668_v8 = vmov 0.0  }
  0x56   :  { %1280 = vmatprep.subr.bf16.mxu0 %v1668_v8  ;;  %vm1669_vm1 = vmmov 0   ;;  %v1349_v9 = vld [vmem:[#allocation7 + $0x10] sm:$0xff]   ;;  %1292 = vmatprep.subr.bf16.mxu1 %v1668_v8  ;;  %v1350_v10 = vld [vmem:[#allocation7 + $0x8] sm:$0xff]   ;;  %v1351_v11 = vld [vmem:[#allocation7] sm:$0xff]   ;;  %s1937_s23 = sld [smem:[#allocation26_spill]]  ;;  %v1670_v60 = vmov 0  }
  0x57   :  { %1288 = vmatprep.mubr.msk.bf16.mxu0 %vm1669_vm1, %v1668_v8  ;;  %1281 = vmatpush3.bf16.msra.mxu0 %v1348_v7  ;;  %s1938_s0 = sld [smem:[#allocation27_spill]]  ;;  %v1161_v22 = vld [vmem:[%s1913_s7] ss:$0 sm:$0xff]  ;;  %v1352_v29 = vld [vmem:[#allocation8 + $0x38] sm:$0xff]   ;;  %v1354_v35 = vld [vmem:[#allocation8 + $0x28] sm:$0xff]  }
  0x58   :  { %1282 = vmatprep.subr.bf16.mxu0 %v1668_v8  ;;  %1308 = vmatprep.mubr.msk.bf16.mxu1 %vm1669_vm1, %v1668_v8  ;;  %v1353_v30 = vld [vmem:[#allocation8 + $0x30] sm:$0xff]   ;;  %v1355_v36 = vld [vmem:[#allocation8 + $0x20] sm:$0xff]   ;;  %v1356_v37 = vld [vmem:[#allocation8 + $0x18] sm:$0xff]  }
  0x59   :  { %1293 = vmatpush3.bf16.msra.mxu1 %v1352_v29  ;;  %v1357_v38 = vld [vmem:[#allocation8 + $0x10] sm:$0xff]   ;;  %v1358_v39 = vld [vmem:[#allocation8 + $0x8] sm:$0xff]   ;;  %v1359_v40 = vld [vmem:[#allocation8] sm:$0xff]   ;;  %1347 = vset.pattern.permute.xlu0 %v1670_v60 }
  0x5a   :  { %1294 = vmatprep.subr.bf16.mxu1 %v1668_v8  ;;  %v1167_v45 = vld [vmem:[%s1914_s8] ss:$0 sm:$0xff]  ;;  %v1362_v59 = vld [vmem:[#allocation10 + $0xe4] ss:$16 sps:$4 sm:$0xff]   ;;  %v1363_v61 = vld [vmem:[#allocation10 + $0xe8] ss:$16 sps:$4 sm:$0xff]  }
  0x5b   :  { %v148_v0 = vld [vmem:[%s1936_s4] sm:$0xff]  ;;  %1283 = vmatpush3.bf16.msra.mxu0 %v1349_v9  ;;  %v1365_v62 = vld [vmem:[#allocation10 + $0xec] ss:$16 sps:$4 sm:$0xff]   ;;  %v1375_v7 = vld [vmem:[#allocation10 + $0xa8] ss:$16 sps:$4 sm:$0xff]  }
  0x5c   :  { %v152_v1 = vsel %vm151_vm0, %v148_v0, 0.0  ;;  %1284 = vmatprep.subr.bf16.mxu0 %v1668_v8  ;;  %v1159_v16 = vld [vmem:[%s1937_s23] ss:$0 sm:$0xff]  ;;  %v1368_v63 = vld [vmem:[#allocation10 + $0xc4] ss:$16 sps:$4 sm:$0xff]  }
  0x5d   :  { %153 = vadd.xlane.f32.xlu0 %v152_v1  ;;  %v1160_v18 = vld [vmem:[%s1938_s0] ss:$0 sm:$0xff]  ;;  %1295 = vmatpush3.bf16.msra.mxu1 %v1353_v30  ;;  %v1380_v9 = vld [vmem:[#allocation10 + $0x84] ss:$16 sps:$4 sm:$0xff]   ;;  %v1413_v30 = vld [vmem:[#allocation10 + $0x1ec] ss:$16 sps:$4 sm:$0xff]  }
  0x5e   :  { %1296 = vmatprep.subr.bf16.mxu1 %v1668_v8  ;;  %v1168_v47 = vld [vmem:[%s1915_s9] ss:$0 sm:$0xff]  ;;  %v1410_v29 = vld [vmem:[#allocation10 + $0x1e4] ss:$16 sps:$4 sm:$0xff]  }
  0x5f   :  { %1285 = vmatpush3.bf16.msra.mxu0 %v1350_v10  ;;  %v1169_v51 = vld [vmem:[%s1917_s11] ss:$0 sm:$0xff]  ;;  %s1939_s11 = sld [smem:[#allocation24_spill]]  ;;  %v1383_v10 = vld [vmem:[#allocation10 + $0x8c] ss:$16 sps:$4 sm:$0xff]  }
  0x60   :  { %1286 = vmatprep.subr.bf16.mxu0 %v1668_v8  ;;  %v1360_v58 = vld [vmem:[#allocation10 + $0xe0] ss:$16 sps:$4 sm:$0xff]   ;;  %v1446_v60 = vld [vmem:[#allocation10 + $0x124] ss:$16 sps:$4 sm:$0xff]  }
  0x61   :  { %1297 = vmatpush3.bf16.msra.mxu1 %v1354_v35  ;;  %v1414_v35 = vld [vmem:[#allocation10 + $0x1c0] ss:$16 sps:$4 sm:$0xff]  }
  0x62   :  { %1298 = vmatprep.subr.bf16.mxu1 %v1668_v8 }
  0x63   :  { %1287 = vmatpush3.bf16.msra.mxu0 %v1351_v11  ;;  %v1378_v11 = vld [vmem:[#allocation10 + $0x80] ss:$16 sps:$4 sm:$0xff]  }
  0x64   :  { %848 = vmatprep.subr.bf16.mxu0 %v1362_v59  ;;  %v1441_v59 = vld [vmem:[#allocation10 + $0x148] ss:$16 sps:$4 sm:$0xff]  }
  0x65   :  { %1299 = vmatpush3.bf16.msra.mxu1 %v1355_v36  ;;  %v433_v1 = vld [vmem:[%s1939_s11] sm:$0xff]  ;;  %v1417_v36 = vld [vmem:[#allocation10 + $0x1c8] ss:$16 sps:$4 sm:$0xff]  }
  0x66   :  { %1300 = vmatprep.subr.bf16.mxu1 %v1668_v8 }
  0x69   :  { %1301 = vmatpush3.bf16.msra.mxu1 %v1356_v37 }
  0x6a   :  { %1302 = vmatprep.subr.bf16.mxu1 %v1668_v8 }
  0x6d   :  { %1303 = vmatpush3.bf16.msra.mxu1 %v1357_v38 }
  0x6e   :  { %1304 = vmatprep.subr.bf16.mxu1 %v1668_v8 }
  0x71   :  { %1305 = vmatpush3.bf16.msra.mxu1 %v1358_v39 }
  0x72   :  { %1306 = vmatprep.subr.bf16.mxu1 %v1668_v8 }
  0x75   :  { %1307 = vmatpush3.bf16.msra.mxu1 %v1359_v40 }
  0x76   :  { %889 = vmatprep.subr.bf16.mxu1 %v1365_v62  ;;  %v1449_v62 = vld [vmem:[#allocation10 + $0x12c] ss:$16 sps:$4 sm:$0xff]  }
  0xe6   :  { %v154_v2 = vpop.xlane.xlu0 %153 }
  0xe7   :  { %v156_v3 = vmul.f32 0.015625, %v154_v2  ;;  %v1366_v2 = vld [vmem:[#allocation10 + $0xc0] ss:$16 sps:$4 sm:$0xff]  }
  0xe9   :  { %v157_v4 = vsub.f32 %v148_v0, %v156_v3  ;;  %v1371_v0 = vld [vmem:[#allocation10 + $0xcc] ss:$16 sps:$4 sm:$0xff]   ;;  %v1369_v3 = vld [vmem:[#allocation10 + $0xc8] ss:$16 sps:$4 sm:$0xff]  }
  0xeb   :  { %v158_v5 = vmul.f32 %v157_v4, %v157_v4 }
  0xed   :  { %v159_v6 = vsel %vm151_vm0, %v158_v5, 0.0  ;;  %v1377_v5 = vld [vmem:[#allocation10 + $0xac] ss:$16 sps:$4 sm:$0xff]  }
  0xee   :  { %160 = vadd.xlane.f32.xlu0 %v159_v6  ;;  %v1372_v6 = vld [vmem:[#allocation10 + $0xa0] ss:$16 sps:$4 sm:$0xff]  }
 0x177   :  { %v161_v12 = vpop.xlane.xlu0 %160 }
 0x178   :  { %v162_v13 = vmul.f32 0.015625, %v161_v12  ;;  %v1381_v12 = vld [vmem:[#allocation10 + $0x88] ss:$16 sps:$4 sm:$0xff]  }
 0x17a   :  { %v163_v14 = vadd.f32 1e-05, %v162_v13  ;;  %v1386_v13 = vld [vmem:[#allocation10 + $0x64] ss:$16 sps:$4 sm:$0xff]  }
 0x17c   :  { %1464 = vrsqrt.f32 %v163_v14  ;;  %v1389_v14 = vld [vmem:[#allocation10 + $0x6c] ss:$16 sps:$4 sm:$0xff]  }
 0x189   :  { %v1465_v15 = vpop.eup %1464 }
 0x18a   :  { %v165_v17 = vmul.f32 %v1465_v15, %v157_v4  ;;  %v1374_v4 = vld [vmem:[#allocation10 + $0xa4] ss:$16 sps:$4 sm:$0xff]   ;;  %v1384_v15 = vld [vmem:[#allocation10 + $0x60] ss:$16 sps:$4 sm:$0xff]  }
 0x18c   :  { %v172_v19 = vmul.f32 %v1159_v16, %v165_v17  ;;  %v1387_v16 = vld [vmem:[#allocation10 + $0x68] ss:$16 sps:$4 sm:$0xff]   ;;  %v1392_v17 = vld [vmem:[#allocation10 + $0x44] ss:$16 sps:$4 sm:$0xff]  }
 0x18e   :  { %v179_v20 = vadd.f32 %v1160_v18, %v172_v19  ;;  %v1395_v18 = vld [vmem:[#allocation10 + $0x4c] ss:$16 sps:$4 sm:$0xff]   ;;  %v1390_v19 = vld [vmem:[#allocation10 + $0x40] ss:$16 sps:$4 sm:$0xff]  }
 0x190   :  { %v180_v21 = vpack.c.bf16 %v179_v20, %v179_v20  ;;  %v1393_v20 = vld [vmem:[#allocation10 + $0x48] ss:$16 sps:$4 sm:$0xff]  }
 0x192   :  { %1289 = vmatmul.mubr.msk.bf16.vlgmr.msra.gmra.mxu0 %vm151_vm0, %v180_v21  ;;  %v1398_v21 = vld [vmem:[#allocation10 + $0x24] ss:$16 sps:$4 sm:$0xff]  }
 0x193   :  { %849 = vmatpush1.bf16.msra.mxu0 %v1360_v58  ;;  %v1438_v58 = vld [vmem:[#allocation10 + $0x140] ss:$16 sps:$4 sm:$0xff]  }
 0x194   :  { %850 = vmatprep.subr.bf16.mxu0 %v1368_v63  ;;  %v1444_v63 = vld [vmem:[#allocation10 + $0x120] ss:$16 sps:$4 sm:$0xff]  }
 0x197   :  { %851 = vmatpush1.bf16.msra.mxu0 %v1366_v2  ;;  %v1455_v2 = vld [vmem:[#allocation10 + $0x10c] ss:$16 sps:$4 sm:$0xff]  }
 0x198   :  { %852 = vmatprep.subr.bf16.mxu0 %v1374_v4  ;;  %v1453_v4 = vld [vmem:[#allocation10 + $0x108] ss:$16 sps:$4 sm:$0xff]  }
 0x19b   :  { %853 = vmatpush1.bf16.msra.mxu0 %v1372_v6 }
 0x19c   :  { %854 = vmatprep.subr.bf16.mxu0 %v1380_v9 }
 0x19f   :  { %855 = vmatpush1.bf16.msra.mxu0 %v1378_v11 }
 0x1a0   :  { %856 = vmatprep.subr.bf16.mxu0 %v1386_v13 }
 0x1a3   :  { %857 = vmatpush1.bf16.msra.mxu0 %v1384_v15 }
 0x1a4   :  { %858 = vmatprep.subr.bf16.mxu0 %v1392_v17 }
 0x1a7   :  { %859 = vmatpush1.bf16.msra.mxu0 %v1390_v19  ;;  %v506_v19 = vld [vmem:[%s1921_s15] sm:$0xf] }
 0x1a8   :  { %860 = vmatprep.subr.bf16.mxu0 %v1398_v21 }
 0x252   :  { %v257_v23 = vpop.f32.mrf.mxu0 }
 0x253   :  { %v258_v24 = vadd.f32 %v1161_v22, %v257_v23  ;;  %v1401_v22 = vld [vmem:[#allocation10 + $0x2c] ss:$16 sps:$4 sm:$0xff]   ;;  %v1396_v23 = vld [vmem:[#allocation10 + $0x20] ss:$16 sps:$4 sm:$0xff]  }
 0x254   :  { %v1290_v25 = vpop.f32.mrf.mxu0  ;;  %861 = vmatpush1.bf16.msra.mxu0 %v1396_v23 }
 0x255   :  { %v263_v26 = vmax.f32 %v258_v24, 0.0  ;;  %v1399_v24 = vld [vmem:[#allocation10 + $0x28] ss:$16 sps:$4 sm:$0xff]   ;;  %v1404_v25 = vld [vmem:[#allocation10 + $0x4] ss:$16 sps:$4 sm:$0xff]  }
 0x256   :  { %v260_v27 = vpop.f32.mrf.mxu0  ;;  %862 = vmatprep.subr.bf16.mxu0 %v1404_v25 }
 0x257   :  { %266 = vadd.xlane.f32.xlu1 %v263_v26  ;;  %v1402_v27 = vld [vmem:[#allocation10] ss:$16 sps:$4 sm:$0xff]  }
 0x258   :  { %v1291_v28 = vpop.f32.mrf.mxu0  ;;  %863 = vmatpush1.bf16.msra.mxu0 %v1402_v27 }
 0x259   :  { %v1405_v28 = vld [vmem:[#allocation10 + $0x8] ss:$16 sps:$4 sm:$0xff]   ;;  %864 = vmatprep.subr.bf16.mxu0 %v1410_v29 }
 0x2e0   :  { %v267_v31 = vpop.xlane.xlu1 %266 }
 0x2e1   :  { %v269_v32 = vmul.f32 0.0078125, %v267_v31  ;;  %v1408_v31 = vld [vmem:[#allocation10 + $0x1e0] ss:$16 sps:$4 sm:$0xff]  }
 0x2e2   :  { %865 = vmatpush2.bf16.msra.mxu0 %v1408_v31 }
 0x2e3   :  { %v270_v33 = vsub.f32 %v263_v26, %v269_v32  ;;  %v1407_v26 = vld [vmem:[#allocation10 + $0xc] ss:$16 sps:$4 sm:$0xff]   ;;  %v1411_v32 = vld [vmem:[#allocation10 + $0x1e8] ss:$16 sps:$4 sm:$0xff]  }
 0x2e5   :  { %v271_v34 = vmul.f32 %v270_v33, %v270_v33 }
 0x2e7   :  { %272 = vadd.xlane.f32.xlu1 %v271_v34  ;;  %v1419_v34 = vld [vmem:[#allocation10 + $0x1cc] ss:$16 sps:$4 sm:$0xff]  }
 0x370   :  { %v273_v41 = vpop.xlane.xlu1 %272 }
 0x371   :  { %v274_v42 = vmul.f32 0.0078125, %v273_v41  ;;  %v1422_v41 = vld [vmem:[#allocation10 + $0x1a4] ss:$16 sps:$4 sm:$0xff]  }
 0x373   :  { %v275_v43 = vadd.f32 1e-05, %v274_v42  ;;  %v1425_v42 = vld [vmem:[#allocation10 + $0x1ac] ss:$16 sps:$4 sm:$0xff]  }
 0x375   :  { %1466 = vrsqrt.f32 %v275_v43  ;;  %v1420_v43 = vld [vmem:[#allocation10 + $0x1a0] ss:$16 sps:$4 sm:$0xff]  }
 0x382   :  { %v1467_v44 = vpop.eup %1466 }
 0x383   :  { %v277_v46 = vmul.f32 %v1467_v44, %v270_v33  ;;  %v1416_v33 = vld [vmem:[#allocation10 + $0x1c4] ss:$16 sps:$4 sm:$0xff]   ;;  %v1423_v44 = vld [vmem:[#allocation10 + $0x1a8] ss:$16 sps:$4 sm:$0xff]  }
 0x384   :  { %866 = vmatprep.subr.bf16.mxu0 %v1416_v33 }
 0x385   :  { %v284_v48 = vmul.f32 %v1167_v45, %v277_v46  ;;  %867 = vmatpush2.bf16.msra.mxu0 %v1414_v35  ;;  %v1426_v45 = vld [vmem:[#allocation10 + $0x180] ss:$16 sps:$4 sm:$0xff]   ;;  %v1428_v46 = vld [vmem:[#allocation10 + $0x184] ss:$16 sps:$4 sm:$0xff]  }
 0x386   :  { %868 = vmatprep.subr.bf16.mxu0 %v1422_v41 }
 0x387   :  { %v291_v49 = vadd.f32 %v1168_v47, %v284_v48  ;;  %v1429_v47 = vld [vmem:[#allocation10 + $0x188] ss:$16 sps:$4 sm:$0xff]   ;;  %v1431_v48 = vld [vmem:[#allocation10 + $0x18c] ss:$16 sps:$4 sm:$0xff]  }
 0x389   :  { %v292_v50 = vpack.c.bf16 %v291_v49, %v291_v49  ;;  %869 = vmatpush2.bf16.msra.mxu0 %v1420_v43  ;;  %v1434_v49 = vld [vmem:[#allocation10 + $0x164] ss:$16 sps:$4 sm:$0xff]  }
 0x38a   :  { %870 = vmatprep.subr.bf16.mxu0 %v1428_v46 }
 0x38b   :  { %1309 = vmatmul.mubr.bf16.vlgmr.msra.gmra.mxu1 %v292_v50  ;;  %v1437_v50 = vld [vmem:[#allocation10 + $0x16c] ss:$16 sps:$4 sm:$0xff]  }
 0x38c   :  { %890 = vmatpush1.bf16.msra.mxu1 %v1363_v61 }
 0x38d   :  { %891 = vmatprep.subr.bf16.mxu1 %v1371_v0  ;;  %871 = vmatpush2.bf16.msra.mxu0 %v1426_v45  ;;  %v1447_v0 = vld [vmem:[#allocation10 + $0x128] ss:$16 sps:$4 sm:$0xff]  }
 0x38e   :  { %872 = vmatprep.subr.bf16.mxu0 %v1434_v49 }
 0x390   :  { %892 = vmatpush1.bf16.msra.mxu1 %v1369_v3  ;;  %v1450_v3 = vld [vmem:[#allocation10 + $0x100] ss:$16 sps:$4 sm:$0xff]  }
 0x391   :  { %893 = vmatprep.subr.bf16.mxu1 %v1377_v5 }
 0x394   :  { %894 = vmatpush1.bf16.msra.mxu1 %v1375_v7 }
 0x395   :  { %895 = vmatprep.subr.bf16.mxu1 %v1383_v10  ;;  %v1178_v10 = vld [vmem:[%s1918_s12] ss:$0 sm:$0xff] }
 0x398   :  { %896 = vmatpush1.bf16.msra.mxu1 %v1381_v12  ;;  %v1179_v12 = vld [vmem:[%s1919_s13] ss:$0 sm:$0xff] }
 0x399   :  { %897 = vmatprep.subr.bf16.mxu1 %v1389_v14 }
 0x39c   :  { %898 = vmatpush1.bf16.msra.mxu1 %v1387_v16  ;;  %v508_v16 = vlaneseq }
 0x39d   :  { %899 = vmatprep.subr.bf16.mxu1 %v1395_v18 }
 0x39e   :  { %v509_v17 = vshrl.u32 %v508_v16, 7 }
 0x3a0   :  { %900 = vmatpush1.bf16.msra.mxu1 %v1393_v20  ;;  %v510_v18 = vsub.s32 0, %v509_v17  ;;  %v514_v21 = vsub.s32 1, %v509_v17 }
 0x3a1   :  { %901 = vmatprep.subr.bf16.mxu1 %v1401_v22 }
 0x3a2   :  { %v511_v20 = vrot.slane %v506_v19, %v510_v18 }
 0x3a4   :  { %902 = vmatpush1.bf16.msra.mxu1 %v1399_v24 }
 0x3a5   :  { %903 = vmatprep.subr.bf16.mxu1 %v1407_v26 }
 0x3a8   :  { %904 = vmatpush1.bf16.msra.mxu1 %v1405_v28  ;;  %v515_v28 = vrot.slane %v506_v19, %v514_v21  ;;  %v1095_v21 = vand.u32 127, %v508_v16 }
 0x3a9   :  { %905 = vmatprep.subr.bf16.mxu1 %v1413_v30 }
 0x3ac   :  { %906 = vmatpush2.bf16.msra.mxu1 %v1411_v32 }
 0x3ad   :  { %907 = vmatprep.subr.bf16.mxu1 %v1419_v34 }
 0x3b0   :  { %908 = vmatpush2.bf16.msra.mxu1 %v1417_v36 }
 0x3b1   :  { %909 = vmatprep.subr.bf16.mxu1 %v1425_v42 }
 0x3b4   :  { %910 = vmatpush2.bf16.msra.mxu1 %v1423_v44 }
 0x3b5   :  { %911 = vmatprep.subr.bf16.mxu1 %v1431_v48 }
 0x3b8   :  { %912 = vmatpush2.bf16.msra.mxu1 %v1429_v47 }
 0x3b9   :  { %913 = vmatprep.subr.bf16.mxu1 %v1437_v50 }
 0x44b   :  { %v398_v52 = vpop.f32.mrf.mxu1 }
 0x44c   :  { %v1850_v53 = vadd.f32 %v1169_v51, %v398_v52  ;;  %v1432_v51 = vld [vmem:[#allocation10 + $0x160] ss:$16 sps:$4 sm:$0xff]  }
 0x44d   :  { %v1310_v54 = vpop.f32.mrf.mxu1  ;;  %873 = vmatpush2.bf16.msra.mxu0 %v1432_v51 }
 0x44e   :  { %v404_v55 = vmax.f32 %v1850_v53, 0.0  ;;  %v1435_v53 = vld [vmem:[#allocation10 + $0x168] ss:$16 sps:$4 sm:$0xff]   ;;  %v1440_v54 = vld [vmem:[#allocation10 + $0x144] ss:$16 sps:$4 sm:$0xff]  }
 0x44f   :  { %v401_v56 = vpop.f32.mrf.mxu1  ;;  %914 = vmatpush2.bf16.msra.mxu1 %v1435_v53  ;;  %874 = vmatprep.subr.bf16.mxu0 %v1440_v54  ;;  %v1456_v54 = vld [vmem:[#allocation11 + $0x38] sm:$0xff]  }
 0x450   :  { %407 = vadd.xlane.f32.xlu0 %v404_v55  ;;  %v432_v56 = vld [vmem:[#allocation2] sm:$0xff] }
 0x451   :  { %v1311_v57 = vpop.f32.mrf.mxu1  ;;  %875 = vmatpush2.bf16.msra.mxu0 %v1438_v58 }
 0x452   :  { %876 = vmatprep.subr.bf16.mxu0 %v1446_v60 }
 0x455   :  { %877 = vmatpush2.bf16.msra.mxu0 %v1444_v63  ;;  %v1461_v63 = vld [vmem:[#allocation11 + $0x10] sm:$0xff]  }
 0x466   :  { %436 = vperm.xlu0 %1347, %v433_v1   ;;  %v1452_v1 = vld [vmem:[#allocation10 + $0x104] ss:$16 sps:$4 sm:$0xff]  }
 0x467   :  { %878 = vmatprep.subr.bf16.mxu0 %v1452_v1  ;;  %v1463_v1 = vld [vmem:[#allocation11] sm:$0xff]  }
 0x468   :  { %879 = vmatpush2.bf16.msra.mxu0 %v1450_v3 }
 0x469   :  { %1312 = vmatprep.subr.bf16.mxu0 %v1668_v8 }
 0x4d9   :  { %v408_v37 = vpop.xlane.xlu0 %407 }
 0x4da   :  { %v409_v38 = vmul.f32 0.0078125, %v408_v37  ;;  %v522_v37 = vsub.s32 3, %v509_v17 }
 0x4dc   :  { %v1860_v39 = vsub.f32 %v404_v55, %v409_v38  ;;  %v1443_v55 = vld [vmem:[#allocation10 + $0x14c] ss:$16 sps:$4 sm:$0xff]   ;;  %v518_v38 = vsub.s32 2, %v509_v17 }
 0x4dd   :  { %915 = vmatprep.subr.bf16.mxu1 %v1443_v55  ;;  %v1457_v55 = vld [vmem:[#allocation11 + $0x30] sm:$0xff]  }
 0x4de   :  { %v411_v40 = vmul.f32 %v1860_v39, %v1860_v39  ;;  %916 = vmatpush2.bf16.msra.mxu1 %v1441_v59  ;;  %v519_v41 = vrot.slane %v506_v19, %v518_v38 }
 0x4df   :  { %917 = vmatprep.subr.bf16.mxu1 %v1449_v62  ;;  %v1460_v62 = vld [vmem:[#allocation11 + $0x18] sm:$0xff]  }
 0x4e0   :  { %412 = vadd.xlane.f32.xlu1 %v411_v40  ;;  %v523_v40 = vrot.slane %v506_v19, %v522_v37 }
 0x4e1   :  { %v437_v52 = vpop.permute.xlu0 %436 }
 0x4e2   :  { %v1864_v57 = vmul.f32 %v437_v52, %v432_v56  ;;  %918 = vmatpush2.bf16.msra.mxu1 %v1447_v0  ;;  %v1462_v0 = vld [vmem:[#allocation11 + $0x8] sm:$0xff]  }
 0x4e3   :  { %919 = vmatprep.subr.bf16.mxu1 %v1455_v2 }
 0x4e4   :  { %v441_v61 = vpack.c.bf16 %v1864_v57, %v1864_v57 }
 0x4e6   :  { %880 = vmatprep.mubr.bf16.mxu0 %v441_v61  ;;  %921 = vmatprep.mubr.bf16.mxu1 %v441_v61  ;;  %v1458_v61 = vld [vmem:[#allocation11 + $0x28] sm:$0xff]  }
 0x4e7   :  { %920 = vmatpush2.bf16.msra.mxu1 %v1453_v4 }
 0x569   :  { %v413_v5 = vpop.xlane.xlu1 %412 }
 0x56a   :  { %v414_v6 = vmul.f32 0.0078125, %v413_v5 }
 0x56c   :  { %v415_v7 = vadd.f32 1e-05, %v414_v6  ;;  %v1246_v6 = vld [vmem:[%s1922_s16] ss:$0 sm:$0xff]  ;;  %s1671_s16 = smov [#allocation14]  }
 0x56e   :  { %1468 = vrsqrt.f32 %v415_v7 }
 0x57b   :  { %v1469_v9 = vpop.eup %1468 }
 0x57c   :  { %v417_v11 = vmul.f32 %v1469_v9, %v1860_v39  ;;  %v1247_v9 = vld [vmem:[%s1923_s17] ss:$0 sm:$0xff]  ;;  %s1143_s17 = sshll.u32 %s1671_s16, 4  ;;  %s1144_s17 = int_to_ptr.vmem [resolvable:$true] %s1143_s17 }
 0x57d   :  { %p1611_p3 = scmp.lt.s32.totalorder %s1144_s17, %s1144_s17 }
 0x57e   :  { %v424_v13 = vmul.f32 %v1178_v10, %v417_v11 }
 0x580   :  { %v431_v14 = vadd.f32 %v1179_v12, %v424_v13  ;;  %v1248_v13 = vld [vmem:[%s1925_s19] ss:$0 sm:$0xff]  ;;  %s1606_s19 = scalar_lea.vmem %s1144_s17, 128 }
 0x581   :  { %p1607_p2 = scmp.ne.s32.totalorder %s1144_s17, %s1606_s19  ;;  %p1612_p4 = scmp.lt.s32.totalorder %s1606_s19, %s1606_s19 }
 0x582   :  { %v440_v15 = vpack.c.bf16 %v431_v14, %v431_v14 }
 0x583   :  { %p1613_p5 = por %p1612_p4, %p1611_p3 }
 0x584   :  { %881 = vmatmul.mubr.bf16.vlgmr.msra.gmra.mxu0 %v440_v15  ;;  %922 = vmatmul.mubr.bf16.vlgmr.msra.gmra.mxu1 %v440_v15 }
 0x585   :  { %1328 = vmatprep.mubr.msk.bf16.mxu0 %vm1669_vm1, %v1668_v8  ;;  %1313 = vmatpush3.bf16.msra.mxu0 %v1456_v54  ;;  %p1614_p6 = pnand %p1613_p5, %p1607_p2 }
 0x586   :  { %1314 = vmatprep.subr.bf16.mxu0 %v1668_v8 }
 0x589   :  { %1315 = vmatpush3.bf16.msra.mxu0 %v1457_v55 }
 0x58a   :  { %1316 = vmatprep.subr.bf16.mxu0 %v1668_v8 }
 0x58d   :  { %1317 = vmatpush3.bf16.msra.mxu0 %v1458_v61 }
 0x58e   :  { %1318 = vmatprep.subr.bf16.mxu0 %v1668_v8 }
 0x644   :  { %v882_v22 = vpop.f32.mrf.mxu0  ;;  %v923_v23 = vpop.f32.mrf.mxu1 }
 0x645   :  { %v883_v24 = vadd.f32 %v882_v22, %v511_v20  ;;  %v924_v45 = vadd.f32 %v923_v23, %v519_v41 }
 0x646   :  { %v884_v25 = vpop.f32.mrf.mxu0  ;;  %v925_v26 = vpop.f32.mrf.mxu1 }
 0x647   :  { %v1244_v27 = vmul.f32 -1.442695, %v883_v24  ;;  %v885_v33 = vadd.f32 %v884_v25, %v515_v28  ;;  %v926_v43 = vadd.f32 %v925_v26, %v523_v40 }
 0x648   :  { %v886_v29 = vpop.f32.mrf.mxu0  ;;  %v927_v30 = vpop.f32.mrf.mxu1 }
 0x649   :  { %1470 = vpow2.f32 %v1244_v27  ;;  %v1245_v34 = vmul.f32 -1.442695, %v885_v33 }
 0x64a   :  { %v887_v31 = vpop.f32.mrf.mxu0  ;;  %v928_v32 = vpop.f32.mrf.mxu1 }
 0x64b   :  { %1472 = vpow2.f32 %v1245_v34 }
 0x656   :  { %v1471_v35 = vpop.eup %1470 }
 0x657   :  { %v933_v36 = vadd.f32 1.0, %v1471_v35 }
 0x658   :  { %v1473_v39 = vpop.eup %1472 }
 0x659   :  { %1474 = vrcp.f32 %v933_v36  ;;  %v939_v42 = vadd.f32 1.0, %v1473_v39 }
 0x65b   :  { %1476 = vrcp.f32 %v939_v42 }
 0x666   :  { %v1475_v44 = vpop.eup %1474 }
 0x667   :  { %v942_v46 = vmul.f32 %v1475_v44, %v926_v43 }
 0x668   :  { %v1477_v48 = vpop.eup %1476 }
 0x669   :  { %v943_v47 = vadd.f32 %v942_v46, %v924_v45  ;;  %v945_v49 = vsub.f32 1.0, %v1477_v48  ;;  %v947_v52 = vmul.f32 %v1477_v48, %v1864_v57  ;;  %v1459_v57 = vld [vmem:[#allocation11 + $0x20] sm:$0xff]  }
 0x66a   :  { %1319 = vmatpush3.bf16.msra.mxu0 %v1459_v57 }
 0x66b   :  { %1478 = vtanh.f32 %v943_v47  ;;  %1320 = vmatprep.subr.bf16.mxu0 %v1668_v8 }
 0x66e   :  { %1321 = vmatpush3.bf16.msra.mxu0 %v1460_v62 }
 0x66f   :  { %1322 = vmatprep.subr.bf16.mxu0 %v1668_v8 }
 0x672   :  { %1323 = vmatpush3.bf16.msra.mxu0 %v1461_v63 }
 0x673   :  { %1324 = vmatprep.subr.bf16.mxu0 %v1668_v8 }
 0x676   :  { %1325 = vmatpush3.bf16.msra.mxu0 %v1462_v0 }
 0x677   :  { %1326 = vmatprep.subr.bf16.mxu0 %v1668_v8  ;;  %v1089_v8 = vld [vmem:[#allocation5] sm:$0xff] }
 0x678   :  { %v1479_v50 = vpop.eup %1478  ;;  %vm1090_vm2 = vcmp.gt.f32.partialorder %v1089_v8, 0.0 }
 0x679   :  { %v946_v51 = vmul.f32 %v1479_v50, %v945_v49 }
 0x67a   :  { %1327 = vmatpush3.bf16.msra.mxu0 %v1463_v1 }
 0x67b   :  { %v948_v53 = vadd.f32 %v947_v52, %v946_v51 }
 0x67d   :  { %952 = vadd.xlane.f32.xlu1 %v948_v53  ;;  %949 = vst [vmem:[#allocation14] sm:$0xff] %v948_v53 }
 0x706   :  { %v953_v56 = vpop.xlane.xlu1 %952 }
 0x707   :  { %v954_v58 = vmul.f32 0.0078125, %v953_v56 }
 0x709   :  { %v955_v59 = vsub.f32 %v948_v53, %v954_v58 }
 0x70b   :  { %v956_v60 = vmul.f32 %v955_v59, %v955_v59 }
 0x70d   :  { %957 = vadd.xlane.f32.xlu1 %v956_v60 }
 0x796   :  { %v958_v2 = vpop.xlane.xlu1 %957 }
 0x797   :  { %v959_v3 = vmul.f32 0.0078125, %v958_v2 }
 0x799   :  { %v960_v4 = vadd.f32 1e-05, %v959_v3 }
 0x79b   :  { %1480 = vrsqrt.f32 %v960_v4 }
 0x7a8   :  { %v1481_v5 = vpop.eup %1480 }
 0x7a9   :  { %v962_v7 = vmul.f32 %v1481_v5, %v955_v59 }
 0x7ab   :  { %v969_v10 = vmul.f32 %v1246_v6, %v962_v7 }
 0x7ad   :  { %v976_v11 = vadd.f32 %v1247_v9, %v969_v10 }
 0x7af   :  { %v977_v12 = vpack.c.bf16 %v976_v11, %v976_v11 }
 0x7b1   :  { %1329 = vmatmul.mubr.bf16.vlgmr.msra.gmra.mxu0 %v977_v12 }
 0x871   :  { %v1083_v14 = vpop.f32.mrf.mxu0 }
 0x872   :  { %v1084_v15 = vadd.f32 %v1248_v13, %v1083_v14 }
 0x873   :  { %v1330_v17 = vpop.f32.mrf.mxu0 }
 0x874   :  { %v1091_v18 = vsel %vm1090_vm2, %v1084_v15, -1e+10 }
 0x875   :  { %1092 = vmax.xlane.f32.xlu1 %v1091_v18  ;;  %v1086_v19 = vpop.f32.mrf.mxu0 }
 0x877   :  { %v1331_v20 = vpop.f32.mrf.mxu0 }
 0x8fe   :  { %v1093_v22 = vpop.xlane.xlu1 %1092 }
 0x8ff   :  { %v1112_v23 = vsub.f32 %v1091_v18, %v1093_v22  ;;  %vm1096_vm3 = vcmp.ge.f32.partialorder %v1091_v18, %v1093_v22 }
 0x900   :  { %v1097_v24 = vsel %vm1096_vm3, %v1095_v21, 128 }
 0x901   :  { %v1113_v25 = vmul.f32 1.442695, %v1112_v23  ;;  %v1099_v26 = vshra.s32 %v1097_v24, 16  ;;  %v1098_v29 = vand.u32 65535, %v1097_v24 }
 0x903   :  { %1482 = vpow2.f32 %v1113_v25  ;;  %v1101_v27 = vcvt.s32.f32 %v1099_v26  ;;  %v1100_v31 = vcvt.s32.f32 %v1098_v29 }
 0x905   :  { %1102 = vmin.xlane.f32.xlu1 %v1101_v27 }
 0x910   :  { %v1483_v28 = vpop.eup %1482 }
 0x911   :  { %1115 = vadd.xlane.f32.xlu1 %v1483_v28 }
 0x98e   :  { %v1103_v30 = vpop.xlane.xlu1 %1102 }
 0x98f   :  { %vm1104_vm4 = vcmp.eq.f32.partialorder %v1101_v27, %v1103_v30 }
 0x990   :  { %v1105_v32 = vsel %vm1104_vm4, %v1100_v31, inf }
 0x991   :  { %1106 = vmin.xlane.f32.xlu1 %v1105_v32 }
 0x992   :  { %1617 = shalt.err (!%p1614_p6)
}
 0x993   :  { %1146 = dma.vmem_to_hbm [thread:$0]  %s1144_s17, 128, %s1927_s21, [#allocation15]   ;;  %v1109_v35 = vcvt.f32.s32 %v1103_v30  ;;  %vm1123_vm5 = vcmp.eq.s32.totalorder %v1095_v21, 1  ;;  %vm1121_vm6 = vcmp.eq.s32.totalorder %v1095_v21, 0 }
 0x994   :  { %s1672_s0 = smov [#allocation13]  }
 0x995   :  { %v1110_v38 = vshll.u32 %v1109_v35, 16  ;;  %s1133_s30 = sshll.u32 %s1672_s0, 4  ;;  %s1134_s30 = int_to_ptr.vmem [resolvable:$true] %s1133_s30 }
 0x996   :  { %s1626_s21 = scalar_lea.vmem %s1134_s30, 128  ;;  %p1631_p8 = scmp.lt.s32.totalorder %s1134_s30, %s1134_s30 }
 0x997   :  { %p1627_p7 = scmp.ne.s32.totalorder %s1134_s30, %s1626_s21  ;;  %p1632_p9 = scmp.lt.s32.totalorder %s1626_s21, %s1626_s21 }
 0x999   :  { %p1633_p10 = por %p1632_p9, %p1631_p8 }
 0x99a   :  { %v1116_v16 = vpop.xlane.xlu1 %1115 }
 0x99b   :  { %1484 = vlog2.f32 %v1116_v16  ;;  %p1634_p11 = pnand %p1633_p10, %p1627_p7 }
 0x9a8   :  { %v1485_v33 = vpop.eup %1484 }
 0x9a9   :  { %v1118_v34 = vmul.f32 0.6931472, %v1485_v33 }
 0x9ab   :  { %v1119_v36 = vadd.f32 %v1118_v34, %v1093_v22 }
 0x9ad   :  { %v1120_v40 = vsub.f32 %v1093_v22, %v1119_v36 }
 0x9af   :  { %v1124_v43 = vsel %vm1123_vm5, %v1120_v40, 0.0 }
 0xa1a   :  { %v1107_v37 = vpop.xlane.xlu1 %1106 }
 0xa1b   :  { %v1108_v39 = vcvt.f32.s32 %v1107_v37 }
 0xa1d   :  { %v1111_v41 = vadd.s32 %v1110_v38, %v1108_v39 }
 0xa1f   :  { %v1122_v42 = vcvt.s32.f32 %v1111_v41 }
 0xa21   :  { %v1125_v44 = vsel %vm1121_vm6, %v1122_v42, %v1124_v43 }
 0xa22   :  { %1126 = vst [vmem:[#allocation13] sm:$0xff] %v1125_v44 }
 0xa23   :  { %1637 = shalt.err (!%p1634_p11)
}
 0xa24   :  { %1136 = dma.vmem_to_hbm [thread:$0]  %s1134_s30, 128, %s1926_s20, [#allocation4]  }
 0xa25   :  { %1654 = dma.done.wait [#allocation4], 128  }
 0xa26   :  { %1655 = vsyncadd [#allocation4], 4294967168 }
 0xa27   :  { %1656 = dma.done.wait [#allocation15], 128  }
 0xa28   :  { %1657 = vsyncadd [#allocation15], 4294967168 }
 0xa29   :  { %1153 = vsyncpa [#allocation3], 1 }
 0xa2a   :  { %1154 = vsyncpa [#allocation6], 1 }
 0xa2b   :  { %1155 = vsyncpa [#allocation9], 1 }
 0xa2c   :  { %1156 = vsyncpa [#allocation12], 1 }
 0xa2d   :  { %1157 = vsyncpa [#allocation4], 1 }
 0xa2e   :  { %1158 = vsyncpa [#allocation15], 1 }

</bundles_post_ra>
